<compile_context>
chip_gen: v7x
topology: tpu7x:2x2x1
jax: 0.10.0
libtpu: 0.0.40
codegen_flags: <defaults>
</compile_context>

<pallas_src>
import functools

import jax
import jax.numpy as jnp
from jax import lax
from jax.experimental import pallas as pl
from jax.experimental.pallas import tpu as pltpu


def _lstm_kernel(xp_ref, whh_ref, wout_ref, bout_ref, h0_ref, c0_ref,
                 out_ref, hn_ref, cn_ref, *,
                 hidden_size, seq_len, unroll, compute_final_state):
    H = hidden_size

    def cell(gates_x, h, c):
        # Read W_hh^T inside the cell (do NOT hoist: 64-vreg value would pin the
        # whole register file and spill the carries).  Gate order here is the
        # reordered [i, f, o, g] produced by the wrapper.
        gates = gates_x + jnp.dot(h, whh_ref[...],
                                  preferred_element_type=jnp.float32)
        sig = jax.nn.sigmoid(gates[:, 0:3 * H])        # one contiguous (B, 3H) slab
        i_g = sig[:, 0 * H:1 * H]
        f_g = sig[:, 1 * H:2 * H]
        o_g = sig[:, 2 * H:3 * H]
        g_g = jnp.tanh(gates[:, 3 * H:4 * H])
        c_new = f_g * c + i_g * g_g
        h_new = o_g * jnp.tanh(c_new)
        return h_new, c_new

    # Step 0 peeled: PyTorch classifies from lstm_output[0] (hidden state after
    # the FIRST time step), so capture it once here.
    h_first, c1 = cell(xp_ref[0], h0_ref[...], c0_ref[...])

    if compute_final_state and seq_len > 1:
        def body(t, carry):
            h, c = carry
            return cell(xp_ref[t], h, c)
        h_last, c_last = lax.fori_loop(1, seq_len, body, (h_first, c1),
                                       unroll=unroll)
    else:
        # Log-probs only depend on step 0; steps 1..S-1 exist only for h_n/c_n.
        h_last, c_last = h_first, c1

    # Classifier head, off the recurrent critical path.
    logits = (jnp.dot(h_first, wout_ref[...], preferred_element_type=jnp.float32)
              + bout_ref[...])
    m = jnp.max(logits, axis=-1, keepdims=True)
    lse = jnp.log(jnp.sum(jnp.exp(logits - m), axis=-1, keepdims=True)) + m
    out_ref[...] = (logits - lse).astype(out_ref.dtype)

    hn_ref[...] = h_last.astype(hn_ref.dtype)
    cn_ref[...] = c_last.astype(cn_ref.dtype)


def _reorder_ifgo_to_ifog(a, axis=0):
    """Permute PyTorch gate blocks [i, f, g, o] -> [i, f, o, g] along `axis`."""
    i, f, g, o = jnp.split(a, 4, axis=axis)
    return jnp.concatenate([i, f, o, g], axis=axis)


def confusion_lstm_forward(x_bsi, h0, c0, params, *,
                           compute_final_state=True, batch_blocks=1):
    """x_bsi: (batch, seq, input)   [layout the PyTorch forward receives before permute]
       h0, c0: (num_layers=1, batch, hidden)
       returns: (log_probs (batch, output), (h_n, c_n) each (1, batch, hidden))"""
    B, S, I = x_bsi.shape
    H = params["w_hh"].shape[1]          # w_hh: (4H, H)
    O = params["w_out"].shape[0]         # w_out: (O, H)
    f32 = jnp.float32
    assert B % batch_blocks == 0 and (B // batch_blocks) % 8 == 0, \
        "each batch block must keep >=8 sublanes"
    Bb = B // batch_blocks

    # Gate-reordered weights/biases ([i, f, o, g]) so the kernel can fuse the
    # three sigmoids into one contiguous slab.
    w_ih_r = _reorder_ifgo_to_ifog(params["w_ih"].astype(f32), axis=0)   # (4H, I)
    w_hh_r = _reorder_ifgo_to_ifog(params["w_hh"].astype(f32), axis=0)   # (4H, H)
    b_r = _reorder_ifgo_to_ifog((params["b_ih"] + params["b_hh"]).astype(f32),
                                axis=0)                                   # (4H,)

    # Hoisted input projection as ONE big matmul, emitted directly in time-major
    # (S, B, 4H) layout with the biases folded in (no separate transpose pass).
    x_proj = (jnp.einsum("bsi,gi->sbg", x_bsi.astype(f32), w_ih_r,
                         precision="highest")
              + b_r)                                                      # (S, B, 4H)

    whh_t = jnp.transpose(w_hh_r)                                         # (H, 4H)
    wout_t = jnp.transpose(params["w_out"]).astype(f32)                   # (H, O)
    bout = params["b_out"].reshape(1, O).astype(f32)
    h0_2d = h0[0].astype(f32)                                             # (B, H)
    c0_2d = c0[0].astype(f32)

    # Cap the unroll: the recurrence is a dependence chain, full unroll past
    # the scheduler window only hurts i-mem / live ranges.
    unroll = True if S <= 16 else 8

    kernel = functools.partial(_lstm_kernel, hidden_size=H, seq_len=S,
                               unroll=unroll,
                               compute_final_state=compute_final_state)

    out, hn, cn = pl.pallas_call(
        kernel,
        grid=(batch_blocks,),                            # "parallel" batch axis (v7x dual-TC)
        in_specs=[
            pl.BlockSpec((S, Bb, 4 * H), lambda b: (0, b, 0)),   # x_proj (whole sequence)
            pl.BlockSpec((H, 4 * H), lambda b: (0, 0)),          # W_hh^T
            pl.BlockSpec((H, O), lambda b: (0, 0)),              # W_out^T
            pl.BlockSpec((1, O), lambda b: (0, 0)),              # b_out
            pl.BlockSpec((Bb, H), lambda b: (b, 0)),             # h0
            pl.BlockSpec((Bb, H), lambda b: (b, 0)),             # c0
        ],
        out_specs=[
            pl.BlockSpec((Bb, O), lambda b: (b, 0)),             # log_probs
            pl.BlockSpec((Bb, H), lambda b: (b, 0)),             # h_n
            pl.BlockSpec((Bb, H), lambda b: (b, 0)),             # c_n
        ],
        out_shape=[
            jax.ShapeDtypeStruct((B, O), f32),
            jax.ShapeDtypeStruct((B, H), f32),
            jax.ShapeDtypeStruct((B, H), f32),
        ],
        compiler_params=pltpu.CompilerParams(
            dimension_semantics=("parallel",)),
    )(x_proj, whh_t, wout_t, bout, h0_2d, c0_2d)

    return out, (hn[None], cn[None])


def _reference_forward(x_bsi, h0, c0, params):
    """Pure-JAX reference mirroring the PyTorch forward (original gate order)."""
    x_sbi = jnp.transpose(x_bsi, (1, 0, 2))
    H = params["w_hh"].shape[1]
    wih_t = params["w_ih"].T
    whh_t = params["w_hh"].T
    b = params["b_ih"] + params["b_hh"]

    def step(carry, x_t):
        h, c = carry
        g = (jnp.dot(x_t, wih_t, precision="highest")
             + jnp.dot(h, whh_t, precision="highest") + b)
        i = jax.nn.sigmoid(g[:, 0 * H:1 * H])
        f = jax.nn.sigmoid(g[:, 1 * H:2 * H])
        gg = jnp.tanh(g[:, 2 * H:3 * H])
        o = jax.nn.sigmoid(g[:, 3 * H:4 * H])
        c_new = f * c + i * gg
        h_new = o * jnp.tanh(c_new)
        return (h_new, c_new), h_new

    (h_n, c_n), outs = jax.lax.scan(step, (h0[0], c0[0]), x_sbi)
    logits = jnp.dot(outs[0], params["w_out"].T, precision="highest") + params["b_out"]
    logp = jax.nn.log_softmax(logits, axis=1)
    return logp, (h_n[None], c_n[None])


if __name__ == "__main__":
    # Small shapes consistent with the module, chosen vreg-friendly:
    # batch multiple of 8 (sublanes), hidden multiple of 128 (lanes).
    batch, seq, input_size, hidden_size, output_size = 8, 8, 16, 128, 8

    key = jax.random.PRNGKey(0)
    ks = jax.random.split(key, 8)
    bound = 1.0 / jnp.sqrt(hidden_size)

    params = {
        "w_ih": jax.random.uniform(ks[0], (4 * hidden_size, input_size), jnp.float32, -bound, bound),
        "w_hh": jax.random.uniform(ks[1], (4 * hidden_size, hidden_size), jnp.float32, -bound, bound),
        "b_ih": jax.random.uniform(ks[2], (4 * hidden_size,), jnp.float32, -bound, bound),
        "b_hh": jax.random.uniform(ks[3], (4 * hidden_size,), jnp.float32, -bound, bound),
        "w_out": jax.random.uniform(ks[4], (output_size, hidden_size), jnp.float32, -bound, bound),
        "b_out": jax.random.uniform(ks[5], (output_size,), jnp.float32, -bound, bound),
    }

    x = jax.random.normal(ks[6], (batch, seq, input_size), jnp.float32)
    # init_hidden: zeros (num_layers, batch, hidden)
    h0 = jnp.zeros((1, batch, hidden_size), jnp.float32)
    c0 = jnp.zeros((1, batch, hidden_size), jnp.float32)

    out, (h_n, c_n) = confusion_lstm_forward(x, h0, c0, params)
    jax.block_until_ready((out, h_n, c_n))

    ref_out, (ref_h, ref_c) = _reference_forward(x, h0, c0, params)
    assert jnp.allclose(out, ref_out, atol=2e-5, rtol=2e-5)
    assert jnp.allclose(h_n, ref_h, atol=2e-5, rtol=2e-5)
    assert jnp.allclose(c_n, ref_c, atol=2e-5, rtol=2e-5)

    print("KERNEL_OK")
</pallas_src>

<mosaic_0001>
module attributes {stable_mosaic.version = 11 : i64} {
  func.func @_lstm_kernel(%arg0: i32, %arg1: memref<8x8x512xf32, #tpu.memory_space<vmem>>, %arg2: memref<128x512xf32, #tpu.memory_space<vmem>>, %arg3: memref<128x8xf32, #tpu.memory_space<vmem>>, %arg4: memref<1x8xf32, #tpu.memory_space<vmem>>, %arg5: memref<8x128xf32, #tpu.memory_space<vmem>>, %arg6: memref<8x128xf32, #tpu.memory_space<vmem>>, %arg7: memref<8x8xf32, #tpu.memory_space<vmem>>, %arg8: memref<8x128xf32, #tpu.memory_space<vmem>>, %arg9: memref<8x128xf32, #tpu.memory_space<vmem>>) attributes {dimension_semantics = [#tpu.dimension_semantics<parallel>], iteration_bounds = array<i64: 1>, scalar_prefetch = 0 : i64, scratch_operands = 0 : i64, tpu.core_type = #tpu.core_type<tc>, window_params = [{transform_indices = @transform_0, window_bounds = array<i64: 8, 8, 512>}, {pipeline_mode = #tpu.pipeline_mode<synchronous>, transform_indices = @transform_1, window_bounds = array<i64: 128, 512>}, {pipeline_mode = #tpu.pipeline_mode<synchronous>, transform_indices = @transform_2, window_bounds = array<i64: 128, 8>}, {pipeline_mode = #tpu.pipeline_mode<synchronous>, transform_indices = @transform_3, window_bounds = array<i64: 1, 8>}, {transform_indices = @transform_4, window_bounds = array<i64: 8, 128>}, {transform_indices = @transform_5, window_bounds = array<i64: 8, 128>}, {transform_indices = @transform_6, window_bounds = array<i64: 8, 8>}, {transform_indices = @transform_7, window_bounds = array<i64: 8, 128>}, {transform_indices = @transform_8, window_bounds = array<i64: 8, 128>}]} {
    %c0 = arith.constant 0 : index
    %c0_0 = arith.constant 0 : index
    %c0_1 = arith.constant 0 : index
    %0 = vector.load %arg1[%c0, %c0_0, %c0_1] : memref<8x8x512xf32, #tpu.memory_space<vmem>>, vector<1x8x512xf32>
    %1 = vector.shape_cast %0 : vector<1x8x512xf32> to vector<8x512xf32>
    %c0_2 = arith.constant 0 : index
    %c0_3 = arith.constant 0 : index
    %2 = vector.load %arg5[%c0_2, %c0_3] : memref<8x128xf32, #tpu.memory_space<vmem>>, vector<8x128xf32>
    %c0_4 = arith.constant 0 : index
    %c0_5 = arith.constant 0 : index
    %3 = vector.load %arg6[%c0_4, %c0_5] : memref<8x128xf32, #tpu.memory_space<vmem>>, vector<8x128xf32>
    %c0_6 = arith.constant 0 : index
    %c0_7 = arith.constant 0 : index
    %4 = vector.load %arg2[%c0_6, %c0_7] : memref<128x512xf32, #tpu.memory_space<vmem>>, vector<128x512xf32>
    %cst = arith.constant dense<0.000000e+00> : vector<8x512xf32>
    %5 = tpu.matmul %2, %4, %cst {dimension_numbers = #tpu.dot_dimension_numbers<[1], [0], [0], [1], [0, 0, 1, 1], [], []>} : vector<8x128xf32>, vector<128x512xf32>, vector<8x512xf32> -> vector<8x512xf32>
    %6 = arith.addf %1, %5 : vector<8x512xf32>
    %7 = vector.extract_strided_slice %6 {offsets = [0, 0], sizes = [8, 384], strides = [1, 1]} : vector<8x512xf32> to vector<8x384xf32>
    %8 = arith.negf %7 : vector<8x384xf32>
    %9 = math.exp %8 : vector<8x384xf32>
    %cst_8 = arith.constant 1.000000e+00 : f32
    %10 = vector.broadcast %cst_8 : f32 to vector<8x384xf32>
    %11 = arith.addf %10, %9 : vector<8x384xf32>
    %12 = arith.divf %10, %11 : vector<8x384xf32>
    %13 = vector.extract_strided_slice %12 {offsets = [0, 0], sizes = [8, 128], strides = [1, 1]} : vector<8x384xf32> to vector<8x128xf32>
    %14 = vector.extract_strided_slice %12 {offsets = [0, 128], sizes = [8, 128], strides = [1, 1]} : vector<8x384xf32> to vector<8x128xf32>
    %15 = vector.extract_strided_slice %12 {offsets = [0, 256], sizes = [8, 128], strides = [1, 1]} : vector<8x384xf32> to vector<8x128xf32>
    %16 = vector.extract_strided_slice %6 {offsets = [0, 384], sizes = [8, 128], strides = [1, 1]} : vector<8x512xf32> to vector<8x128xf32>
    %17 = math.tanh %16 : vector<8x128xf32>
    %18 = arith.mulf %14, %3 : vector<8x128xf32>
    %19 = arith.mulf %13, %17 : vector<8x128xf32>
    %20 = arith.addf %18, %19 : vector<8x128xf32>
    %21 = math.tanh %20 : vector<8x128xf32>
    %22 = arith.mulf %15, %21 : vector<8x128xf32>
    %c1_i32 = arith.constant 1 : i32
    %23 = arith.index_cast %c1_i32 : i32 to index
    %c0_9 = arith.constant 0 : index
    %c0_10 = arith.constant 0 : index
    %24 = vector.load %arg1[%23, %c0_9, %c0_10] : memref<8x8x512xf32, #tpu.memory_space<vmem>>, vector<1x8x512xf32>
    %25 = vector.shape_cast %24 : vector<1x8x512xf32> to vector<8x512xf32>
    %c0_11 = arith.constant 0 : index
    %c0_12 = arith.constant 0 : index
    %26 = vector.load %arg2[%c0_11, %c0_12] : memref<128x512xf32, #tpu.memory_space<vmem>>, vector<128x512xf32>
    %cst_13 = arith.constant dense<0.000000e+00> : vector<8x512xf32>
    %27 = tpu.matmul %22, %26, %cst_13 {dimension_numbers = #tpu.dot_dimension_numbers<[1], [0], [0], [1], [0, 0, 1, 1], [], []>} : vector<8x128xf32>, vector<128x512xf32>, vector<8x512xf32> -> vector<8x512xf32>
    %28 = arith.addf %25, %27 : vector<8x512xf32>
    %29 = vector.extract_strided_slice %28 {offsets = [0, 0], sizes = [8, 384], strides = [1, 1]} : vector<8x512xf32> to vector<8x384xf32>
    %30 = arith.negf %29 : vector<8x384xf32>
    %31 = math.exp %30 : vector<8x384xf32>
    %cst_14 = arith.constant 1.000000e+00 : f32
    %32 = vector.broadcast %cst_14 : f32 to vector<8x384xf32>
    %33 = arith.addf %32, %31 : vector<8x384xf32>
    %34 = arith.divf %32, %33 : vector<8x384xf32>
    %35 = vector.extract_strided_slice %34 {offsets = [0, 0], sizes = [8, 128], strides = [1, 1]} : vector<8x384xf32> to vector<8x128xf32>
    %36 = vector.extract_strided_slice %34 {offsets = [0, 128], sizes = [8, 128], strides = [1, 1]} : vector<8x384xf32> to vector<8x128xf32>
    %37 = vector.extract_strided_slice %34 {offsets = [0, 256], sizes = [8, 128], strides = [1, 1]} : vector<8x384xf32> to vector<8x128xf32>
    %38 = vector.extract_strided_slice %28 {offsets = [0, 384], sizes = [8, 128], strides = [1, 1]} : vector<8x512xf32> to vector<8x128xf32>
    %39 = math.tanh %38 : vector<8x128xf32>
    %40 = arith.mulf %36, %20 : vector<8x128xf32>
    %41 = arith.mulf %35, %39 : vector<8x128xf32>
    %42 = arith.addf %40, %41 : vector<8x128xf32>
    %43 = math.tanh %42 : vector<8x128xf32>
    %44 = arith.mulf %37, %43 : vector<8x128xf32>
    %c2_i32 = arith.constant 2 : i32
    %45 = arith.index_cast %c2_i32 : i32 to index
    %c0_15 = arith.constant 0 : index
    %c0_16 = arith.constant 0 : index
    %46 = vector.load %arg1[%45, %c0_15, %c0_16] : memref<8x8x512xf32, #tpu.memory_space<vmem>>, vector<1x8x512xf32>
    %47 = vector.shape_cast %46 : vector<1x8x512xf32> to vector<8x512xf32>
    %c0_17 = arith.constant 0 : index
    %c0_18 = arith.constant 0 : index
    %48 = vector.load %arg2[%c0_17, %c0_18] : memref<128x512xf32, #tpu.memory_space<vmem>>, vector<128x512xf32>
    %cst_19 = arith.constant dense<0.000000e+00> : vector<8x512xf32>
    %49 = tpu.matmul %44, %48, %cst_19 {dimension_numbers = #tpu.dot_dimension_numbers<[1], [0], [0], [1], [0, 0, 1, 1], [], []>} : vector<8x128xf32>, vector<128x512xf32>, vector<8x512xf32> -> vector<8x512xf32>
    %50 = arith.addf %47, %49 : vector<8x512xf32>
    %51 = vector.extract_strided_slice %50 {offsets = [0, 0], sizes = [8, 384], strides = [1, 1]} : vector<8x512xf32> to vector<8x384xf32>
    %52 = arith.negf %51 : vector<8x384xf32>
    %53 = math.exp %52 : vector<8x384xf32>
    %cst_20 = arith.constant 1.000000e+00 : f32
    %54 = vector.broadcast %cst_20 : f32 to vector<8x384xf32>
    %55 = arith.addf %54, %53 : vector<8x384xf32>
    %56 = arith.divf %54, %55 : vector<8x384xf32>
    %57 = vector.extract_strided_slice %56 {offsets = [0, 0], sizes = [8, 128], strides = [1, 1]} : vector<8x384xf32> to vector<8x128xf32>
    %58 = vector.extract_strided_slice %56 {offsets = [0, 128], sizes = [8, 128], strides = [1, 1]} : vector<8x384xf32> to vector<8x128xf32>
    %59 = vector.extract_strided_slice %56 {offsets = [0, 256], sizes = [8, 128], strides = [1, 1]} : vector<8x384xf32> to vector<8x128xf32>
    %60 = vector.extract_strided_slice %50 {offsets = [0, 384], sizes = [8, 128], strides = [1, 1]} : vector<8x512xf32> to vector<8x128xf32>
    %61 = math.tanh %60 : vector<8x128xf32>
    %62 = arith.mulf %58, %42 : vector<8x128xf32>
    %63 = arith.mulf %57, %61 : vector<8x128xf32>
    %64 = arith.addf %62, %63 : vector<8x128xf32>
    %65 = math.tanh %64 : vector<8x128xf32>
    %66 = arith.mulf %59, %65 : vector<8x128xf32>
    %c3_i32 = arith.constant 3 : i32
    %67 = arith.index_cast %c3_i32 : i32 to index
    %c0_21 = arith.constant 0 : index
    %c0_22 = arith.constant 0 : index
    %68 = vector.load %arg1[%67, %c0_21, %c0_22] : memref<8x8x512xf32, #tpu.memory_space<vmem>>, vector<1x8x512xf32>
    %69 = vector.shape_cast %68 : vector<1x8x512xf32> to vector<8x512xf32>
    %c0_23 = arith.constant 0 : index
    %c0_24 = arith.constant 0 : index
    %70 = vector.load %arg2[%c0_23, %c0_24] : memref<128x512xf32, #tpu.memory_space<vmem>>, vector<128x512xf32>
    %cst_25 = arith.constant dense<0.000000e+00> : vector<8x512xf32>
    %71 = tpu.matmul %66, %70, %cst_25 {dimension_numbers = #tpu.dot_dimension_numbers<[1], [0], [0], [1], [0, 0, 1, 1], [], []>} : vector<8x128xf32>, vector<128x512xf32>, vector<8x512xf32> -> vector<8x512xf32>
    %72 = arith.addf %69, %71 : vector<8x512xf32>
    %73 = vector.extract_strided_slice %72 {offsets = [0, 0], sizes = [8, 384], strides = [1, 1]} : vector<8x512xf32> to vector<8x384xf32>
    %74 = arith.negf %73 : vector<8x384xf32>
    %75 = math.exp %74 : vector<8x384xf32>
    %cst_26 = arith.constant 1.000000e+00 : f32
    %76 = vector.broadcast %cst_26 : f32 to vector<8x384xf32>
    %77 = arith.addf %76, %75 : vector<8x384xf32>
    %78 = arith.divf %76, %77 : vector<8x384xf32>
    %79 = vector.extract_strided_slice %78 {offsets = [0, 0], sizes = [8, 128], strides = [1, 1]} : vector<8x384xf32> to vector<8x128xf32>
    %80 = vector.extract_strided_slice %78 {offsets = [0, 128], sizes = [8, 128], strides = [1, 1]} : vector<8x384xf32> to vector<8x128xf32>
    %81 = vector.extract_strided_slice %78 {offsets = [0, 256], sizes = [8, 128], strides = [1, 1]} : vector<8x384xf32> to vector<8x128xf32>
    %82 = vector.extract_strided_slice %72 {offsets = [0, 384], sizes = [8, 128], strides = [1, 1]} : vector<8x512xf32> to vector<8x128xf32>
    %83 = math.tanh %82 : vector<8x128xf32>
    %84 = arith.mulf %80, %64 : vector<8x128xf32>
    %85 = arith.mulf %79, %83 : vector<8x128xf32>
    %86 = arith.addf %84, %85 : vector<8x128xf32>
    %87 = math.tanh %86 : vector<8x128xf32>
    %88 = arith.mulf %81, %87 : vector<8x128xf32>
    %c4_i32 = arith.constant 4 : i32
    %89 = arith.index_cast %c4_i32 : i32 to index
    %c0_27 = arith.constant 0 : index
    %c0_28 = arith.constant 0 : index
    %90 = vector.load %arg1[%89, %c0_27, %c0_28] : memref<8x8x512xf32, #tpu.memory_space<vmem>>, vector<1x8x512xf32>
    %91 = vector.shape_cast %90 : vector<1x8x512xf32> to vector<8x512xf32>
    %c0_29 = arith.constant 0 : index
    %c0_30 = arith.constant 0 : index
    %92 = vector.load %arg2[%c0_29, %c0_30] : memref<128x512xf32, #tpu.memory_space<vmem>>, vector<128x512xf32>
    %cst_31 = arith.constant dense<0.000000e+00> : vector<8x512xf32>
    %93 = tpu.matmul %88, %92, %cst_31 {dimension_numbers = #tpu.dot_dimension_numbers<[1], [0], [0], [1], [0, 0, 1, 1], [], []>} : vector<8x128xf32>, vector<128x512xf32>, vector<8x512xf32> -> vector<8x512xf32>
    %94 = arith.addf %91, %93 : vector<8x512xf32>
    %95 = vector.extract_strided_slice %94 {offsets = [0, 0], sizes = [8, 384], strides = [1, 1]} : vector<8x512xf32> to vector<8x384xf32>
    %96 = arith.negf %95 : vector<8x384xf32>
    %97 = math.exp %96 : vector<8x384xf32>
    %cst_32 = arith.constant 1.000000e+00 : f32
    %98 = vector.broadcast %cst_32 : f32 to vector<8x384xf32>
    %99 = arith.addf %98, %97 : vector<8x384xf32>
    %100 = arith.divf %98, %99 : vector<8x384xf32>
    %101 = vector.extract_strided_slice %100 {offsets = [0, 0], sizes = [8, 128], strides = [1, 1]} : vector<8x384xf32> to vector<8x128xf32>
    %102 = vector.extract_strided_slice %100 {offsets = [0, 128], sizes = [8, 128], strides = [1, 1]} : vector<8x384xf32> to vector<8x128xf32>
    %103 = vector.extract_strided_slice %100 {offsets = [0, 256], sizes = [8, 128], strides = [1, 1]} : vector<8x384xf32> to vector<8x128xf32>
    %104 = vector.extract_strided_slice %94 {offsets = [0, 384], sizes = [8, 128], strides = [1, 1]} : vector<8x512xf32> to vector<8x128xf32>
    %105 = math.tanh %104 : vector<8x128xf32>
    %106 = arith.mulf %102, %86 : vector<8x128xf32>
    %107 = arith.mulf %101, %105 : vector<8x128xf32>
    %108 = arith.addf %106, %107 : vector<8x128xf32>
    %109 = math.tanh %108 : vector<8x128xf32>
    %110 = arith.mulf %103, %109 : vector<8x128xf32>
    %c5_i32 = arith.constant 5 : i32
    %111 = arith.index_cast %c5_i32 : i32 to index
    %c0_33 = arith.constant 0 : index
    %c0_34 = arith.constant 0 : index
    %112 = vector.load %arg1[%111, %c0_33, %c0_34] : memref<8x8x512xf32, #tpu.memory_space<vmem>>, vector<1x8x512xf32>
    %113 = vector.shape_cast %112 : vector<1x8x512xf32> to vector<8x512xf32>
    %c0_35 = arith.constant 0 : index
    %c0_36 = arith.constant 0 : index
    %114 = vector.load %arg2[%c0_35, %c0_36] : memref<128x512xf32, #tpu.memory_space<vmem>>, vector<128x512xf32>
    %cst_37 = arith.constant dense<0.000000e+00> : vector<8x512xf32>
    %115 = tpu.matmul %110, %114, %cst_37 {dimension_numbers = #tpu.dot_dimension_numbers<[1], [0], [0], [1], [0, 0, 1, 1], [], []>} : vector<8x128xf32>, vector<128x512xf32>, vector<8x512xf32> -> vector<8x512xf32>
    %116 = arith.addf %113, %115 : vector<8x512xf32>
    %117 = vector.extract_strided_slice %116 {offsets = [0, 0], sizes = [8, 384], strides = [1, 1]} : vector<8x512xf32> to vector<8x384xf32>
    %118 = arith.negf %117 : vector<8x384xf32>
    %119 = math.exp %118 : vector<8x384xf32>
    %cst_38 = arith.constant 1.000000e+00 : f32
    %120 = vector.broadcast %cst_38 : f32 to vector<8x384xf32>
    %121 = arith.addf %120, %119 : vector<8x384xf32>
    %122 = arith.divf %120, %121 : vector<8x384xf32>
    %123 = vector.extract_strided_slice %122 {offsets = [0, 0], sizes = [8, 128], strides = [1, 1]} : vector<8x384xf32> to vector<8x128xf32>
    %124 = vector.extract_strided_slice %122 {offsets = [0, 128], sizes = [8, 128], strides = [1, 1]} : vector<8x384xf32> to vector<8x128xf32>
    %125 = vector.extract_strided_slice %122 {offsets = [0, 256], sizes = [8, 128], strides = [1, 1]} : vector<8x384xf32> to vector<8x128xf32>
    %126 = vector.extract_strided_slice %116 {offsets = [0, 384], sizes = [8, 128], strides = [1, 1]} : vector<8x512xf32> to vector<8x128xf32>
    %127 = math.tanh %126 : vector<8x128xf32>
    %128 = arith.mulf %124, %108 : vector<8x128xf32>
    %129 = arith.mulf %123, %127 : vector<8x128xf32>
    %130 = arith.addf %128, %129 : vector<8x128xf32>
    %131 = math.tanh %130 : vector<8x128xf32>
    %132 = arith.mulf %125, %131 : vector<8x128xf32>
    %c6_i32 = arith.constant 6 : i32
    %133 = arith.index_cast %c6_i32 : i32 to index
    %c0_39 = arith.constant 0 : index
    %c0_40 = arith.constant 0 : index
    %134 = vector.load %arg1[%133, %c0_39, %c0_40] : memref<8x8x512xf32, #tpu.memory_space<vmem>>, vector<1x8x512xf32>
    %135 = vector.shape_cast %134 : vector<1x8x512xf32> to vector<8x512xf32>
    %c0_41 = arith.constant 0 : index
    %c0_42 = arith.constant 0 : index
    %136 = vector.load %arg2[%c0_41, %c0_42] : memref<128x512xf32, #tpu.memory_space<vmem>>, vector<128x512xf32>
    %cst_43 = arith.constant dense<0.000000e+00> : vector<8x512xf32>
    %137 = tpu.matmul %132, %136, %cst_43 {dimension_numbers = #tpu.dot_dimension_numbers<[1], [0], [0], [1], [0, 0, 1, 1], [], []>} : vector<8x128xf32>, vector<128x512xf32>, vector<8x512xf32> -> vector<8x512xf32>
    %138 = arith.addf %135, %137 : vector<8x512xf32>
    %139 = vector.extract_strided_slice %138 {offsets = [0, 0], sizes = [8, 384], strides = [1, 1]} : vector<8x512xf32> to vector<8x384xf32>
    %140 = arith.negf %139 : vector<8x384xf32>
    %141 = math.exp %140 : vector<8x384xf32>
    %cst_44 = arith.constant 1.000000e+00 : f32
    %142 = vector.broadcast %cst_44 : f32 to vector<8x384xf32>
    %143 = arith.addf %142, %141 : vector<8x384xf32>
    %144 = arith.divf %142, %143 : vector<8x384xf32>
    %145 = vector.extract_strided_slice %144 {offsets = [0, 0], sizes = [8, 128], strides = [1, 1]} : vector<8x384xf32> to vector<8x128xf32>
    %146 = vector.extract_strided_slice %144 {offsets = [0, 128], sizes = [8, 128], strides = [1, 1]} : vector<8x384xf32> to vector<8x128xf32>
    %147 = vector.extract_strided_slice %144 {offsets = [0, 256], sizes = [8, 128], strides = [1, 1]} : vector<8x384xf32> to vector<8x128xf32>
    %148 = vector.extract_strided_slice %138 {offsets = [0, 384], sizes = [8, 128], strides = [1, 1]} : vector<8x512xf32> to vector<8x128xf32>
    %149 = math.tanh %148 : vector<8x128xf32>
    %150 = arith.mulf %146, %130 : vector<8x128xf32>
    %151 = arith.mulf %145, %149 : vector<8x128xf32>
    %152 = arith.addf %150, %151 : vector<8x128xf32>
    %153 = math.tanh %152 : vector<8x128xf32>
    %154 = arith.mulf %147, %153 : vector<8x128xf32>
    %c7_i32 = arith.constant 7 : i32
    %155 = arith.index_cast %c7_i32 : i32 to index
    %c0_45 = arith.constant 0 : index
    %c0_46 = arith.constant 0 : index
    %156 = vector.load %arg1[%155, %c0_45, %c0_46] : memref<8x8x512xf32, #tpu.memory_space<vmem>>, vector<1x8x512xf32>
    %157 = vector.shape_cast %156 : vector<1x8x512xf32> to vector<8x512xf32>
    %c0_47 = arith.constant 0 : index
    %c0_48 = arith.constant 0 : index
    %158 = vector.load %arg2[%c0_47, %c0_48] : memref<128x512xf32, #tpu.memory_space<vmem>>, vector<128x512xf32>
    %cst_49 = arith.constant dense<0.000000e+00> : vector<8x512xf32>
    %159 = tpu.matmul %154, %158, %cst_49 {dimension_numbers = #tpu.dot_dimension_numbers<[1], [0], [0], [1], [0, 0, 1, 1], [], []>} : vector<8x128xf32>, vector<128x512xf32>, vector<8x512xf32> -> vector<8x512xf32>
    %160 = arith.addf %157, %159 : vector<8x512xf32>
    %161 = vector.extract_strided_slice %160 {offsets = [0, 0], sizes = [8, 384], strides = [1, 1]} : vector<8x512xf32> to vector<8x384xf32>
    %162 = arith.negf %161 : vector<8x384xf32>
    %163 = math.exp %162 : vector<8x384xf32>
    %cst_50 = arith.constant 1.000000e+00 : f32
    %164 = vector.broadcast %cst_50 : f32 to vector<8x384xf32>
    %165 = arith.addf %164, %163 : vector<8x384xf32>
    %166 = arith.divf %164, %165 : vector<8x384xf32>
    %167 = vector.extract_strided_slice %166 {offsets = [0, 0], sizes = [8, 128], strides = [1, 1]} : vector<8x384xf32> to vector<8x128xf32>
    %168 = vector.extract_strided_slice %166 {offsets = [0, 128], sizes = [8, 128], strides = [1, 1]} : vector<8x384xf32> to vector<8x128xf32>
    %169 = vector.extract_strided_slice %166 {offsets = [0, 256], sizes = [8, 128], strides = [1, 1]} : vector<8x384xf32> to vector<8x128xf32>
    %170 = vector.extract_strided_slice %160 {offsets = [0, 384], sizes = [8, 128], strides = [1, 1]} : vector<8x512xf32> to vector<8x128xf32>
    %171 = math.tanh %170 : vector<8x128xf32>
    %172 = arith.mulf %168, %152 : vector<8x128xf32>
    %173 = arith.mulf %167, %171 : vector<8x128xf32>
    %174 = arith.addf %172, %173 : vector<8x128xf32>
    %175 = math.tanh %174 : vector<8x128xf32>
    %176 = arith.mulf %169, %175 : vector<8x128xf32>
    %c7_i32_51 = arith.constant 7 : i32
    %c0_52 = arith.constant 0 : index
    %c0_53 = arith.constant 0 : index
    %177 = vector.load %arg3[%c0_52, %c0_53] : memref<128x8xf32, #tpu.memory_space<vmem>>, vector<128x8xf32>
    %cst_54 = arith.constant dense<0.000000e+00> : vector<8x8xf32>
    %178 = tpu.matmul %22, %177, %cst_54 {dimension_numbers = #tpu.dot_dimension_numbers<[1], [0], [0], [1], [0, 0, 1, 1], [], []>} : vector<8x128xf32>, vector<128x8xf32>, vector<8x8xf32> -> vector<8x8xf32>
    %c0_55 = arith.constant 0 : index
    %c0_56 = arith.constant 0 : index
    %179 = vector.load %arg4[%c0_55, %c0_56] : memref<1x8xf32, #tpu.memory_space<vmem>>, vector<1x8xf32>
    %180 = vector.broadcast %179 : vector<1x8xf32> to vector<8x8xf32>
    %181 = arith.addf %178, %180 : vector<8x8xf32>
    %cst_57 = arith.constant dense<0xFF800000> : vector<8xf32>
    %182 = vector.multi_reduction <maximumf>, %181, %cst_57 [1] : vector<8x8xf32> to vector<8xf32>
    %183 = vector.shape_cast %182 : vector<8xf32> to vector<8x1xf32>
    %184 = vector.broadcast %183 : vector<8x1xf32> to vector<8x8xf32>
    %185 = arith.subf %181, %184 : vector<8x8xf32>
    %186 = math.exp %185 : vector<8x8xf32>
    %cst_58 = arith.constant dense<0.000000e+00> : vector<8xf32>
    %187 = vector.multi_reduction <add>, %186, %cst_58 [1] : vector<8x8xf32> to vector<8xf32>
    %188 = vector.shape_cast %187 : vector<8xf32> to vector<8x1xf32>
    %189 = math.log %188 : vector<8x1xf32>
    %190 = arith.addf %189, %183 : vector<8x1xf32>
    %191 = vector.broadcast %190 : vector<8x1xf32> to vector<8x8xf32>
    %192 = arith.subf %181, %191 : vector<8x8xf32>
    %c0_59 = arith.constant 0 : index
    %c0_60 = arith.constant 0 : index
    %193 = vector.load %arg7[%c0_59, %c0_60] : memref<8x8xf32, #tpu.memory_space<vmem>>, vector<8x8xf32>
    tpu.vector_store %arg7[%c0_59, %c0_60], %192 {strides = array<i32>} : memref<8x8xf32, #tpu.memory_space<vmem>>, vector<8x8xf32>,
    %c0_61 = arith.constant 0 : index
    %c0_62 = arith.constant 0 : index
    %194 = vector.load %arg8[%c0_61, %c0_62] : memref<8x128xf32, #tpu.memory_space<vmem>>, vector<8x128xf32>
    tpu.vector_store %arg8[%c0_61, %c0_62], %176 {strides = array<i32>} : memref<8x128xf32, #tpu.memory_space<vmem>>, vector<8x128xf32>,
    %c0_63 = arith.constant 0 : index
    %c0_64 = arith.constant 0 : index
    %195 = vector.load %arg9[%c0_63, %c0_64] : memref<8x128xf32, #tpu.memory_space<vmem>>, vector<8x128xf32>
    tpu.vector_store %arg9[%c0_63, %c0_64], %174 {strides = array<i32>} : memref<8x128xf32, #tpu.memory_space<vmem>>, vector<8x128xf32>,
    return
  }
  func.func @transform_0(%arg0: i32) -> (i32, i32, i32) {
    %c0_i32 = arith.constant 0 : i32
    %c0_i32_0 = arith.constant 0 : i32
    %c0_i32_1 = arith.constant 0 : i32
    return %c0_i32, %arg0, %c0_i32_0 : i32, i32, i32
  }
  func.func @transform_1(%arg0: i32) -> (i32, i32) {
    %c0_i32 = arith.constant 0 : i32
    %c0_i32_0 = arith.constant 0 : i32
    %c0_i32_1 = arith.constant 0 : i32
    return %c0_i32, %c0_i32_0 : i32, i32
  }
  func.func @transform_2(%arg0: i32) -> (i32, i32) {
    %c0_i32 = arith.constant 0 : i32
    %c0_i32_0 = arith.constant 0 : i32
    %c0_i32_1 = arith.constant 0 : i32
    return %c0_i32, %c0_i32_0 : i32, i32
  }
  func.func @transform_3(%arg0: i32) -> (i32, i32) {
    %c0_i32 = arith.constant 0 : i32
    %c0_i32_0 = arith.constant 0 : i32
    %c0_i32_1 = arith.constant 0 : i32
    return %c0_i32, %c0_i32_0 : i32, i32
  }
  func.func @transform_4(%arg0: i32) -> (i32, i32) {
    %c0_i32 = arith.constant 0 : i32
    %c0_i32_0 = arith.constant 0 : i32
    return %arg0, %c0_i32 : i32, i32
  }
  func.func @transform_5(%arg0: i32) -> (i32, i32) {
    %c0_i32 = arith.constant 0 : i32
    %c0_i32_0 = arith.constant 0 : i32
    return %arg0, %c0_i32 : i32, i32
  }
  func.func @transform_6(%arg0: i32) -> (i32, i32) {
    %c0_i32 = arith.constant 0 : i32
    %c0_i32_0 = arith.constant 0 : i32
    return %arg0, %c0_i32 : i32, i32
  }
  func.func @transform_7(%arg0: i32) -> (i32, i32) {
    %c0_i32 = arith.constant 0 : i32
    %c0_i32_0 = arith.constant 0 : i32
    return %arg0, %c0_i32 : i32, i32
  }
  func.func @transform_8(%arg0: i32) -> (i32, i32) {
    %c0_i32 = arith.constant 0 : i32
    %c0_i32_0 = arith.constant 0 : i32
    return %arg0, %c0_i32 : i32, i32
  }
}

</mosaic_0001>

<bundles_post_ra>
// kernel: tpu_custom_call.1
= control target key start
LH: loop header
LB: loop body
LE: loop exit
PB: predicated region body
PF: predicated region fallthrough
CT: control target
= control target key end

     0   :  { %14 = vsyncpa [#allocation3], 0  ;;  %s3100_s0 = inlined_call_operand.hbm [shape: f32[8,8,512], index: 0, kind: input, shape index: {}]   ;;  %s3101_s1 = inlined_call_operand.hbm [shape: f32[128,512], index: 1, kind: input, shape index: {}]   ;;  %s3102_s2 = inlined_call_operand.vmem [shape: f32[128,8], index: 2, kind: input, shape index: {}]   ;;  %s3103_s3 = inlined_call_operand.vmem [shape: f32[1,8], index: 3, kind: input, shape index: {}]   ;;  %s3104_s4 = inlined_call_operand.vmem [shape: f32[8,128], index: 4, kind: input, shape index: {}]   ;;  %s3105_s5 = inlined_call_operand.vmem [shape: f32[8,128], index: 5, kind: input, shape index: {}]   ;;  %s3106_s6 = inlined_call_operand.hbm [shape: f32[8,8], index: 6, kind: output, shape index: {0}]   ;;  %s3107_s7 = inlined_call_operand.hbm [shape: f32[8,128], index: 7, kind: output, shape index: {1}]   ;;  %s3108_s8 = inlined_call_operand.hbm [shape: f32[8,128], index: 8, kind: output, shape index: {2}]  }
   0x1   :  { %15 = vsyncpa [#allocation6], 0 }
   0x2   :  { %16 = vsyncpa [#allocation4], 0 }
   0x3   :  { %17 = vsyncpa [#allocation9], 0  ;;  %s2547_s27 = smov [#allocation2]   ;;  %s2429_s9 = scalar_lea.hbm %s3100_s0, 4096 }
   0x4   :  { %s23_s28 = sshll.u32 %s2547_s27, 4  ;;  %p2430_p0 = scmp.ne.s32.totalorder %s3100_s0, %s2429_s9  ;;  %s24_s28 = int_to_ptr.vmem [resolvable:$true] %s23_s28 }
   0x5   :  { %p2433_p1 = scmp.lt.u32.totalorder %s2429_s9, %s3100_s0 }
   0x7   :  { %p2435_p2 = pnand %p2433_p1, %p2430_p0 }
   0x9   :  { %2438 = shalt.err (!%p2435_p2)
}
   0xa   :  { %s2439_s14 = scalar_lea.vmem %s24_s28, 4096  ;;  %p2444_p4 = scmp.lt.s32.totalorder %s24_s28, %s24_s28 }
   0xb   :  { %p2440_p3 = scmp.ne.s32.totalorder %s24_s28, %s2439_s14  ;;  %p2445_p5 = scmp.lt.s32.totalorder %s2439_s14, %s2439_s14 }
   0xd   :  { %p2446_p6 = por %p2445_p5, %p2444_p4 }
   0xf   :  { %p2447_p7 = pnand %p2446_p6, %p2440_p3 }
  0x11   :  { %2450 = shalt.err (!%p2447_p7)
}
  0x12   :  { %s2548_s15 = smov 512   ;;  %s2549_s16 = smov 32  }
  0x13   :  { %29 = dma.hbm_to_vmem [thread:$0]  %s3100_s0, 4096, %s24_s28, [#allocation3], %s2548_s15, %s2548_s15, %s2549_s16  }
  0x14   :  { %s2550_s19 = smov [#allocation5]   ;;  %s2451_s23 = scalar_lea.hbm %s3101_s1, 8192 }
  0x15   :  { %s35_s20 = sshll.u32 %s2550_s19, 4  ;;  %p2452_p8 = scmp.ne.s32.totalorder %s3101_s1, %s2451_s23  ;;  %s36_s20 = int_to_ptr.vmem [resolvable:$true] %s35_s20 }
  0x16   :  { %p2455_p9 = scmp.lt.u32.totalorder %s2451_s23, %s3101_s1 }
  0x18   :  { %p2457_p10 = pnand %p2455_p9, %p2452_p8 }
  0x1a   :  { %2460 = shalt.err (!%p2457_p10)
}
  0x1b   :  { %s2461_s29 = scalar_lea.vmem %s36_s20, 8192  ;;  %p2466_p12 = scmp.lt.s32.totalorder %s36_s20, %s36_s20 }
  0x1c   :  { %p2462_p11 = scmp.ne.s32.totalorder %s36_s20, %s2461_s29  ;;  %p2467_p13 = scmp.lt.s32.totalorder %s2461_s29, %s2461_s29 }
  0x1e   :  { %p2468_p0 = por %p2467_p13, %p2466_p12 }
  0x20   :  { %p2469_p1 = pnand %p2468_p0, %p2462_p11 }
  0x22   :  { %2472 = shalt.err (!%p2469_p1)
}
  0x23   :  { %41 = dma.hbm_to_vmem [thread:$0]  %s3101_s1, 8192, %s36_s20, [#allocation6], %s2548_s15, %s2548_s15, %s2549_s16  }
  0x24   :  { %2539 = dma.done.wait [#allocation3], 4096  }
  0x25   :  { %2540 = vsyncadd [#allocation3], 4294963200 }
  0x26   :  { %2541 = dma.done.wait [#allocation6], 8192  }
  0x27   :  { %2542 = vsyncadd [#allocation6], 4294959104  ;;  %v2551_v0 = vmov 0.0   ;;  %v63_v1 = vld [vmem:[#allocation5 + $0x8] sm:$0xff]  ;;  %v62_v3 = vld [vmem:[#allocation5] sm:$0xff]  ;;  %vm2553_vm0 = vmmov 0  }
  0x28   :  { %190 = vmatprep.mubr.f32.mxu0 %v2551_v0  ;;  %261 = vmatprep.mubr.f32.mxu1 %v2551_v0  ;;  %v67_v2 = vld [vmem:[#allocation5 + $0x28] sm:$0xff]  ;;  %v66_v5 = vld [vmem:[#allocation5 + $0x20] sm:$0xff]  ;;  %v65_v19 = vld [vmem:[#allocation5 + $0x18] sm:$0xff]  ;;  %vm1614_vm1 = vcmask 64512  }
  0x29   :  { %v2628_v4 = vpack.c.bf16 %v67_v2, %v63_v1  ;;  %v71_v6 = vld [vmem:[#allocation5 + $0x48] sm:$0xff]  ;;  %v2630_v8 = vpack.c.bf16 %v66_v5, %v62_v3  ;;  %v70_v10 = vld [vmem:[#allocation5 + $0x40] sm:$0xff]  ;;  %v69_v20 = vld [vmem:[#allocation5 + $0x38] sm:$0xff] }
  0x2a   :  { %v75_v7 = vld [vmem:[#allocation5 + $0x68] sm:$0xff]  ;;  %v74_v11 = vld [vmem:[#allocation5 + $0x60] sm:$0xff]  ;;  %v2641_v22 = vpack.c.bf16 %v69_v20, %v65_v19  ;;  %v64_v23 = vld [vmem:[#allocation5 + $0x10] sm:$0xff] }
  0x2b   :  { %v2632_v9 = vpack.c.bf16 %v75_v7, %v71_v6  ;;  %v79_v12 = vld [vmem:[#allocation5 + $0x88] sm:$0xff]  ;;  %1752 = vmatprep.subr.bf16.mxu0 %v2628_v4  ;;  %v2636_v14 = vpack.c.bf16 %v74_v11, %v70_v10  ;;  %v78_v15 = vld [vmem:[#allocation5 + $0x80] sm:$0xff]  ;;  %v68_v24 = vld [vmem:[#allocation5 + $0x30] sm:$0xff] }
  0x2c   :  { %v83_v13 = vld [vmem:[#allocation5 + $0xa8] sm:$0xff]  ;;  %1754 = vmatpush1.bf16.msra.mxu0 %v2630_v8  ;;  %v82_v16 = vld [vmem:[#allocation5 + $0xa0] sm:$0xff]  ;;  %v2643_v25 = vpack.c.bf16 %v68_v24, %v64_v23  ;;  %1784 = vmatprep.subr.bf16.mxu1 %v2641_v22  ;;  %v73_v27 = vld [vmem:[#allocation5 + $0x58] sm:$0xff] }
  0x2d   :  { %1756 = vmatprep.subr.bf16.mxu0 %v2632_v9  ;;  %v2639_v17 = vpack.c.bf16 %v83_v13, %v79_v12  ;;  %v87_v18 = vld [vmem:[#allocation5 + $0xc8] sm:$0xff]  ;;  %v2646_v26 = vpack.c.bf16 %v82_v16, %v78_v15  ;;  %v77_v28 = vld [vmem:[#allocation5 + $0x78] sm:$0xff]  ;;  %v72_v29 = vld [vmem:[#allocation5 + $0x50] sm:$0xff] }
  0x2e   :  { %v91_v21 = vld [vmem:[#allocation5 + $0xe8] sm:$0xff]  ;;  %v86_v31 = vld [vmem:[#allocation5 + $0xc0] sm:$0xff]  ;;  %1786 = vmatpush1.bf16.msra.mxu1 %v2643_v25  ;;  %v2653_v33 = vpack.c.bf16 %v77_v28, %v73_v27  ;;  %v76_v34 = vld [vmem:[#allocation5 + $0x70] sm:$0xff] }
  0x2f   :  { %v2650_v30 = vpack.c.bf16 %v91_v21, %v87_v18  ;;  %v90_v32 = vld [vmem:[#allocation5 + $0xe0] sm:$0xff]  ;;  %v95_v35 = vld [vmem:[#allocation5 + $0x108] sm:$0xff]  ;;  %v2655_v37 = vpack.c.bf16 %v76_v34, %v72_v29  ;;  %v81_v38 = vld [vmem:[#allocation5 + $0x98] sm:$0xff] }
  0x30   :  { %1758 = vmatpush1.bf16.msra.mxu0 %v2636_v14  ;;  %v99_v36 = vld [vmem:[#allocation5 + $0x128] sm:$0xff]  ;;  %1788 = vmatprep.subr.bf16.mxu1 %v2653_v33  ;;  %v85_v39 = vld [vmem:[#allocation5 + $0xb8] sm:$0xff]  ;;  %v80_v40 = vld [vmem:[#allocation5 + $0x90] sm:$0xff]  ;;  %v2659_v42 = vpack.c.bf16 %v90_v32, %v86_v31 }
  0x31   :  { %1760 = vmatprep.subr.bf16.mxu0 %v2639_v17  ;;  %v84_v41 = vld [vmem:[#allocation5 + $0xb0] sm:$0xff]  ;;  %v94_v43 = vld [vmem:[#allocation5 + $0x100] sm:$0xff]  ;;  %v2661_v45 = vpack.c.bf16 %v85_v39, %v81_v38  ;;  %v2664_v46 = vpack.c.bf16 %v99_v36, %v95_v35  ;;  %v103_v47 = vld [vmem:[#allocation5 + $0x148] sm:$0xff] }
  0x32   :  { %v98_v44 = vld [vmem:[#allocation5 + $0x120] sm:$0xff]  ;;  %1790 = vmatpush1.bf16.msra.mxu1 %v2655_v37  ;;  %v2667_v48 = vpack.c.bf16 %v84_v41, %v80_v40  ;;  %v89_v49 = vld [vmem:[#allocation5 + $0xd8] sm:$0xff]  ;;  %v107_v51 = vld [vmem:[#allocation5 + $0x168] sm:$0xff] }
  0x33   :  { %v93_v50 = vld [vmem:[#allocation5 + $0xf8] sm:$0xff]  ;;  %1792 = vmatprep.subr.bf16.mxu1 %v2661_v45  ;;  %v88_v53 = vld [vmem:[#allocation5 + $0xd0] sm:$0xff]  ;;  %v2673_v55 = vpack.c.bf16 %v98_v44, %v94_v43  ;;  %v2676_v58 = vpack.c.bf16 %v107_v51, %v103_v47  ;;  %v102_v59 = vld [vmem:[#allocation5 + $0x140] sm:$0xff] }
  0x34   :  { %1762 = vmatpush1.bf16.msra.mxu0 %v2646_v26  ;;  %v2670_v52 = vpack.c.bf16 %v93_v50, %v89_v49  ;;  %v92_v54 = vld [vmem:[#allocation5 + $0xf0] sm:$0xff]  ;;  %v97_v56 = vld [vmem:[#allocation5 + $0x118] sm:$0xff]  ;;  %v106_v60 = vld [vmem:[#allocation5 + $0x160] sm:$0xff] }
  0x35   :  { %1764 = vmatprep.subr.bf16.mxu0 %v2650_v30  ;;  %v101_v57 = vld [vmem:[#allocation5 + $0x138] sm:$0xff]  ;;  %v111_v61 = vld [vmem:[#allocation5 + $0x188] sm:$0xff]  ;;  %v2679_v62 = vpack.c.bf16 %v92_v54, %v88_v53  ;;  %v96_v2 = vld [vmem:[#allocation5 + $0x110] sm:$0xff]  ;;  %v2685_v7 = vpack.c.bf16 %v106_v60, %v102_v59 }
  0x36   :  { %1794 = vmatpush1.bf16.msra.mxu1 %v2667_v48  ;;  %v115_v63 = vld [vmem:[#allocation5 + $0x1a8] sm:$0xff]  ;;  %v2682_v1 = vpack.c.bf16 %v101_v57, %v97_v56  ;;  %v100_v3 = vld [vmem:[#allocation5 + $0x130] sm:$0xff]  ;;  %v105_v5 = vld [vmem:[#allocation5 + $0x158] sm:$0xff] }
  0x37   :  { %1796 = vmatprep.subr.bf16.mxu1 %v2670_v52  ;;  %v109_v6 = vld [vmem:[#allocation5 + $0x178] sm:$0xff]  ;;  %v2688_v10 = vpack.c.bf16 %v115_v63, %v111_v61  ;;  %v110_v11 = vld [vmem:[#allocation5 + $0x180] sm:$0xff]  ;;  %v119_v13 = vld [vmem:[#allocation5 + $0x1c8] sm:$0xff]  ;;  %v2691_v15 = vpack.c.bf16 %v100_v3, %v96_v2 }
  0x38   :  { %1766 = vmatpush1.bf16.msra.mxu0 %v2659_v42  ;;  %v114_v12 = vld [vmem:[#allocation5 + $0x1a0] sm:$0xff]  ;;  %v123_v16 = vld [vmem:[#allocation5 + $0x1e8] sm:$0xff]  ;;  %v2694_v18 = vpack.c.bf16 %v109_v6, %v105_v5  ;;  %v104_v19 = vld [vmem:[#allocation5 + $0x150] sm:$0xff] }
  0x39   :  { %1768 = vmatprep.subr.bf16.mxu0 %v2664_v46  ;;  %v108_v20 = vld [vmem:[#allocation5 + $0x170] sm:$0xff]  ;;  %v113_v21 = vld [vmem:[#allocation5 + $0x198] sm:$0xff]  ;;  %v2697_v24 = vpack.c.bf16 %v114_v12, %v110_v11  ;;  %v2700_v27 = vpack.c.bf16 %v123_v16, %v119_v13  ;;  %v118_v28 = vld [vmem:[#allocation5 + $0x1c0] sm:$0xff] }
  0x3a   :  { %1798 = vmatpush1.bf16.msra.mxu1 %v2679_v62  ;;  %v117_v23 = vld [vmem:[#allocation5 + $0x1b8] sm:$0xff]  ;;  %v122_v29 = vld [vmem:[#allocation5 + $0x1e0] sm:$0xff]  ;;  %v2703_v31 = vpack.c.bf16 %v108_v20, %v104_v19  ;;  %v112_v34 = vld [vmem:[#allocation5 + $0x190] sm:$0xff] }
  0x3b   :  { %1800 = vmatprep.subr.bf16.mxu1 %v2682_v1  ;;  %v2706_v32 = vpack.c.bf16 %v117_v23, %v113_v21  ;;  %v116_v35 = vld [vmem:[#allocation5 + $0x1b0] sm:$0xff]  ;;  %v121_v36 = vld [vmem:[#allocation5 + $0x1d8] sm:$0xff]  ;;  %v2709_v39 = vpack.c.bf16 %v122_v29, %v118_v28  ;;  %v60_v47 = vld [vmem:[%s3104_s4] sm:$0xff] }
  0x3c   :  { %1770 = vmatpush1.bf16.msra.mxu0 %v2673_v55  ;;  %v125_v38 = vld [vmem:[#allocation5 + $0x1f8] sm:$0xff]  ;;  %v2713_v40 = vpack.c.bf16 %v116_v35, %v112_v34  ;;  %v120_v43 = vld [vmem:[#allocation5 + $0x1d0] sm:$0xff]  ;;  %v56_v50 = vld [vmem:[#allocation2] sm:$0xff] }
  0x3d   :  { %1772 = vmatprep.subr.bf16.mxu0 %v2676_v58  ;;  %v2716_v41 = vpack.c.bf16 %v125_v38, %v121_v36  ;;  %v124_v44 = vld [vmem:[#allocation5 + $0x1f0] sm:$0xff]  ;;  %v57_v51 = vld [vmem:[#allocation2 + $0x8] sm:$0xff]  ;;  %v59_v5 = vld [vmem:[#allocation2 + $0x18] sm:$0xff] }
  0x3e   :  { %1802 = vmatpush1.bf16.msra.mxu1 %v2691_v15  ;;  %v2723_v49 = vpack.c.bf16 %v124_v44, %v120_v43  ;;  %v58_v61 = vld [vmem:[#allocation2 + $0x10] sm:$0xff]  ;;  %v61_v23 = vld [vmem:[%s3105_s5] sm:$0xff] }
  0x3f   :  { %1804 = vmatprep.subr.bf16.mxu1 %v2694_v18 }
  0x40   :  { %1774 = vmatpush1.bf16.msra.mxu0 %v2685_v7 }
  0x41   :  { %1776 = vmatprep.subr.bf16.mxu0 %v2688_v10 }
  0x42   :  { %1806 = vmatpush1.bf16.msra.mxu1 %v2703_v31 }
  0x43   :  { %1808 = vmatprep.subr.bf16.mxu1 %v2706_v32 }
  0x44   :  { %1778 = vmatpush1.bf16.msra.mxu0 %v2697_v24 }
  0x45   :  { %1780 = vmatprep.subr.bf16.mxu0 %v2700_v27 }
  0x46   :  { %1810 = vmatpush1.bf16.msra.mxu1 %v2713_v40 }
  0x47   :  { %1812 = vmatprep.subr.bf16.mxu1 %v2716_v41 }
  0x48   :  { %1782 = vmatpush1.bf16.msra.mxu0 %v2709_v39 }
  0x49   :  { %1816 = vmatprep.subr.bf16.mxu0 %v2628_v4 }
  0x4a   :  { %1814 = vmatpush1.bf16.msra.mxu1 %v2723_v49 }
  0x4b   :  { %191 = vmatmul.mubr.f32.vlgmr.msra.gmra.mrb[0].mxu0 %v60_v47  ;;  %1848 = vmatprep.subr.bf16.mxu1 %v2641_v22 }
  0x4c   :  { %1818 = vmatpush1.bf16.msra.mxu0 %v2630_v8  ;;  %365 = vmatprep.mubr.f32.mxu0 %v2551_v0 }
  0x4d   :  { %1820 = vmatprep.subr.bf16.mxu0 %v2632_v9  ;;  %262 = vmatmul.mubr.f32.vlgmr.msra.gmra.mrb[0].mxu1 %v60_v47 }
  0x4e   :  { %1850 = vmatpush1.bf16.msra.mxu1 %v2643_v25  ;;  %436 = vmatprep.mubr.f32.mxu1 %v2551_v0 }
  0x4f   :  { %1852 = vmatprep.subr.bf16.mxu1 %v2653_v33 }
  0x50   :  { %1822 = vmatpush1.bf16.msra.mxu0 %v2636_v14 }
  0x51   :  { %1824 = vmatprep.subr.bf16.mxu0 %v2639_v17 }
  0x52   :  { %1854 = vmatpush1.bf16.msra.mxu1 %v2655_v37 }
  0x53   :  { %1856 = vmatprep.subr.bf16.mxu1 %v2661_v45 }
  0x54   :  { %1826 = vmatpush1.bf16.msra.mxu0 %v2646_v26 }
  0x55   :  { %1828 = vmatprep.subr.bf16.mxu0 %v2650_v30 }
  0x56   :  { %1858 = vmatpush1.bf16.msra.mxu1 %v2667_v48 }
  0x57   :  { %1860 = vmatprep.subr.bf16.mxu1 %v2670_v52 }
  0x58   :  { %1830 = vmatpush1.bf16.msra.mxu0 %v2659_v42 }
  0x59   :  { %1832 = vmatprep.subr.bf16.mxu0 %v2664_v46 }
  0x5a   :  { %1862 = vmatpush1.bf16.msra.mxu1 %v2679_v62 }
  0x5b   :  { %1864 = vmatprep.subr.bf16.mxu1 %v2682_v1 }
  0x5c   :  { %1834 = vmatpush1.bf16.msra.mxu0 %v2673_v55 }
  0x5d   :  { %1836 = vmatprep.subr.bf16.mxu0 %v2676_v58 }
  0x5e   :  { %1866 = vmatpush1.bf16.msra.mxu1 %v2691_v15 }
  0x5f   :  { %1868 = vmatprep.subr.bf16.mxu1 %v2694_v18 }
  0x60   :  { %1838 = vmatpush1.bf16.msra.mxu0 %v2685_v7 }
  0x61   :  { %1840 = vmatprep.subr.bf16.mxu0 %v2688_v10 }
  0x62   :  { %1870 = vmatpush1.bf16.msra.mxu1 %v2703_v31 }
  0x63   :  { %1872 = vmatprep.subr.bf16.mxu1 %v2706_v32 }
  0x64   :  { %1842 = vmatpush1.bf16.msra.mxu0 %v2697_v24 }
  0x65   :  { %1844 = vmatprep.subr.bf16.mxu0 %v2700_v27 }
  0x66   :  { %1874 = vmatpush1.bf16.msra.mxu1 %v2713_v40 }
  0x67   :  { %1876 = vmatprep.subr.bf16.mxu1 %v2716_v41 }
  0x68   :  { %1846 = vmatpush1.bf16.msra.mxu0 %v2709_v39 }
  0x69   :  { %1880 = vmatprep.subr.bf16.mxu0 %v2628_v4 }
  0x6a   :  { %1878 = vmatpush1.bf16.msra.mxu1 %v2723_v49 }
  0x6b   :  { %1912 = vmatprep.subr.bf16.mxu1 %v2641_v22 }
 0x11e   :  { %v192_v53 = vpop.f32.mrb[0].mxu0 }
 0x11f   :  { %v268_v54 = vadd.f32 %v192_v53, %v56_v50  ;;  %v194_v56 = vpop.f32.mrb[1].mxu0  ;;  %v297_v50 = vld [vmem:[#allocation2 + $0x20] sm:$0xff] }
 0x120   :  { %v269_v57 = vadd.f32 %v194_v56, %v57_v51  ;;  %v263_v63 = vpop.f32.mrb[0].mxu1  ;;  %v298_v51 = vld [vmem:[#allocation2 + $0x28] sm:$0xff] }
 0x121   :  { %v1674_v59 = vmul.f32 -1.442695, %v268_v54  ;;  %v265_v2 = vpop.f32.mrb[1].mxu1  ;;  %v270_v3 = vadd.f32 %v263_v63, %v58_v61 }
 0x122   :  { %v1675_v60 = vmul.f32 -1.442695, %v269_v57  ;;  %v271_v11 = vadd.f32 %v265_v2, %v59_v5  ;;  %v299_v2 = vld [vmem:[#allocation2 + $0x30] sm:$0xff]  ;;  %v300_v5 = vld [vmem:[#allocation2 + $0x38] sm:$0xff] }
 0x123   :  { %2297 = vpow2.f32 %v1674_v59  ;;  %v1676_v6 = vmul.f32 -1.442695, %v270_v3 }
 0x124   :  { %2299 = vpow2.f32 %v1675_v60 }
 0x125   :  { %2301 = vpow2.f32 %v1676_v6 }
 0x126   :  { %2303 = vtanh.f32 %v271_v11 }
 0x12d   :  { %v2298_v12 = vpop.eup %2297 }
 0x12e   :  { %v2300_v13 = vpop.eup %2299  ;;  %v281_v16 = vadd.f32 1.0, %v2298_v12 }
 0x12f   :  { %v282_v19 = vadd.f32 1.0, %v2300_v13  ;;  %v2302_v20 = vpop.eup %2301 }
 0x130   :  { %2305 = vrcp.f32 %v281_v16  ;;  %v2304_v21 = vpop.eup %2303  ;;  %v283_v29 = vadd.f32 1.0, %v2302_v20 }
 0x131   :  { %2307 = vrcp.f32 %v282_v19 }
 0x132   :  { %2309 = vrcp.f32 %v283_v29 }
 0x13a   :  { %v2306_v28 = vpop.eup %2305 }
 0x13b   :  { %v2308_v34 = vpop.eup %2307  ;;  %v292_v35 = vmul.f32 %v2306_v28, %v2304_v21 }
 0x13c   :  { %v291_v36 = vmul.f32 %v2308_v34, %v61_v23  ;;  %v2310_v43 = vpop.eup %2309 }
 0x13e   :  { %v2766_v38 = vadd.f32 %v292_v35, %v291_v36 }
 0x140   :  { %2311 = vtanh.f32 %v2766_v38 }
 0x14a   :  { %v2312_v44 = vpop.eup %2311 }
 0x14b   :  { %v2769_v47 = vmul.f32 %v2312_v44, %v2310_v43 }
 0x14d   :  { %366 = vmatmul.mubr.f32.vlgmr.msra.gmra.mrb[2].mxu0 %v2769_v47  ;;  %437 = vmatmul.mubr.f32.vlgmr.msra.gmra.mrb[2].mxu1 %v2769_v47 }
 0x14e   :  { %1882 = vmatpush1.bf16.msra.mxu0 %v2630_v8  ;;  %1914 = vmatpush1.bf16.msra.mxu1 %v2643_v25 }
 0x14f   :  { %1884 = vmatprep.subr.bf16.mxu0 %v2632_v9  ;;  %1916 = vmatprep.subr.bf16.mxu1 %v2653_v33 }
 0x150   :  { %540 = vmatprep.mubr.f32.mxu0 %v2551_v0  ;;  %611 = vmatprep.mubr.f32.mxu1 %v2551_v0 }
 0x152   :  { %1886 = vmatpush1.bf16.msra.mxu0 %v2636_v14  ;;  %1918 = vmatpush1.bf16.msra.mxu1 %v2655_v37 }
 0x153   :  { %1888 = vmatprep.subr.bf16.mxu0 %v2639_v17  ;;  %1920 = vmatprep.subr.bf16.mxu1 %v2661_v45 }
 0x156   :  { %1890 = vmatpush1.bf16.msra.mxu0 %v2646_v26  ;;  %1922 = vmatpush1.bf16.msra.mxu1 %v2667_v48 }
 0x157   :  { %1892 = vmatprep.subr.bf16.mxu0 %v2650_v30  ;;  %1924 = vmatprep.subr.bf16.mxu1 %v2670_v52 }
 0x15a   :  { %1894 = vmatpush1.bf16.msra.mxu0 %v2659_v42  ;;  %1926 = vmatpush1.bf16.msra.mxu1 %v2679_v62 }
 0x15b   :  { %1896 = vmatprep.subr.bf16.mxu0 %v2664_v46  ;;  %1928 = vmatprep.subr.bf16.mxu1 %v2682_v1 }
 0x15e   :  { %1898 = vmatpush1.bf16.msra.mxu0 %v2673_v55  ;;  %1930 = vmatpush1.bf16.msra.mxu1 %v2691_v15 }
 0x15f   :  { %1900 = vmatprep.subr.bf16.mxu0 %v2676_v58  ;;  %1932 = vmatprep.subr.bf16.mxu1 %v2694_v18 }
 0x162   :  { %1902 = vmatpush1.bf16.msra.mxu0 %v2685_v7  ;;  %1934 = vmatpush1.bf16.msra.mxu1 %v2703_v31 }
 0x163   :  { %1904 = vmatprep.subr.bf16.mxu0 %v2688_v10  ;;  %1936 = vmatprep.subr.bf16.mxu1 %v2706_v32 }
 0x166   :  { %1906 = vmatpush1.bf16.msra.mxu0 %v2697_v24  ;;  %1938 = vmatpush1.bf16.msra.mxu1 %v2713_v40 }
 0x167   :  { %1908 = vmatprep.subr.bf16.mxu0 %v2700_v27  ;;  %1940 = vmatprep.subr.bf16.mxu1 %v2716_v41 }
 0x16a   :  { %1910 = vmatpush1.bf16.msra.mxu0 %v2709_v39  ;;  %1942 = vmatpush1.bf16.msra.mxu1 %v2723_v49 }
 0x16b   :  { %1944 = vmatprep.subr.bf16.mxu0 %v2628_v4  ;;  %1976 = vmatprep.subr.bf16.mxu1 %v2641_v22 }
 0x220   :  { %v367_v53 = vpop.f32.mrb[2].mxu0  ;;  %v438_v54 = vpop.f32.mrb[2].mxu1 }
 0x221   :  { %v443_v56 = vadd.f32 %v367_v53, %v297_v50  ;;  %v369_v57 = vpop.f32.mrb[3].mxu0  ;;  %v440_v59 = vpop.f32.mrb[3].mxu1  ;;  %v445_v3 = vadd.f32 %v438_v54, %v299_v2  ;;  %v474_v2 = vld [vmem:[#allocation2 + $0x50] sm:$0xff] }
 0x222   :  { %v444_v60 = vadd.f32 %v369_v57, %v298_v51  ;;  %v446_v6 = vadd.f32 %v440_v59, %v300_v5  ;;  %v473_v51 = vld [vmem:[#allocation2 + $0x48] sm:$0xff]  ;;  %v475_v5 = vld [vmem:[#allocation2 + $0x58] sm:$0xff] }
 0x223   :  { %v1677_v61 = vmul.f32 -1.442695, %v443_v56  ;;  %v1679_v11 = vmul.f32 -1.442695, %v445_v3 }
 0x224   :  { %v1678_v63 = vmul.f32 -1.442695, %v444_v60 }
 0x225   :  { %2313 = vpow2.f32 %v1677_v61 }
 0x226   :  { %2315 = vpow2.f32 %v1678_v63 }
 0x227   :  { %2317 = vtanh.f32 %v446_v6 }
 0x228   :  { %2319 = vpow2.f32 %v1679_v11 }
 0x22f   :  { %v2314_v12 = vpop.eup %2313 }
 0x230   :  { %v456_v13 = vadd.f32 1.0, %v2314_v12  ;;  %v2316_v16 = vpop.eup %2315 }
 0x231   :  { %v457_v19 = vadd.f32 1.0, %v2316_v16  ;;  %v2318_v20 = vpop.eup %2317 }
 0x232   :  { %2321 = vrcp.f32 %v456_v13  ;;  %v2320_v21 = vpop.eup %2319 }
 0x233   :  { %2323 = vrcp.f32 %v457_v19  ;;  %v458_v34 = vadd.f32 1.0, %v2320_v21 }
 0x235   :  { %2325 = vrcp.f32 %v458_v34 }
 0x23c   :  { %v2322_v23 = vpop.eup %2321 }
 0x23d   :  { %v467_v28 = vmul.f32 %v2322_v23, %v2318_v20  ;;  %v2324_v29 = vpop.eup %2323 }
 0x23e   :  { %v466_v35 = vmul.f32 %v2324_v29, %v2766_v38  ;;  %v472_v38 = vld [vmem:[#allocation2 + $0x40] sm:$0xff] }
 0x23f   :  { %v2326_v43 = vpop.eup %2325 }
 0x240   :  { %v2808_v36 = vadd.f32 %v467_v28, %v466_v35 }
 0x242   :  { %2327 = vtanh.f32 %v2808_v36 }
 0x24c   :  { %v2328_v44 = vpop.eup %2327 }
 0x24d   :  { %v470_v50 = vmul.f32 %v2328_v44, %v2326_v43 }
 0x24f   :  { %541 = vmatmul.mubr.f32.vlgmr.msra.gmra.mrb[4].mxu0 %v470_v50  ;;  %612 = vmatmul.mubr.f32.vlgmr.msra.gmra.mrb[4].mxu1 %v470_v50 }
 0x250   :  { %1946 = vmatpush1.bf16.msra.mxu0 %v2630_v8  ;;  %1978 = vmatpush1.bf16.msra.mxu1 %v2643_v25 }
 0x251   :  { %1948 = vmatprep.subr.bf16.mxu0 %v2632_v9  ;;  %1980 = vmatprep.subr.bf16.mxu1 %v2653_v33 }
 0x252   :  { %715 = vmatprep.mubr.f32.mxu0 %v2551_v0  ;;  %786 = vmatprep.mubr.f32.mxu1 %v2551_v0 }
 0x254   :  { %1950 = vmatpush1.bf16.msra.mxu0 %v2636_v14  ;;  %1982 = vmatpush1.bf16.msra.mxu1 %v2655_v37 }
 0x255   :  { %1952 = vmatprep.subr.bf16.mxu0 %v2639_v17  ;;  %1984 = vmatprep.subr.bf16.mxu1 %v2661_v45 }
 0x258   :  { %1954 = vmatpush1.bf16.msra.mxu0 %v2646_v26  ;;  %1986 = vmatpush1.bf16.msra.mxu1 %v2667_v48 }
 0x259   :  { %1956 = vmatprep.subr.bf16.mxu0 %v2650_v30  ;;  %1988 = vmatprep.subr.bf16.mxu1 %v2670_v52 }
 0x25c   :  { %1958 = vmatpush1.bf16.msra.mxu0 %v2659_v42  ;;  %1990 = vmatpush1.bf16.msra.mxu1 %v2679_v62 }
 0x25d   :  { %1960 = vmatprep.subr.bf16.mxu0 %v2664_v46  ;;  %1992 = vmatprep.subr.bf16.mxu1 %v2682_v1 }
 0x260   :  { %1962 = vmatpush1.bf16.msra.mxu0 %v2673_v55  ;;  %1994 = vmatpush1.bf16.msra.mxu1 %v2691_v15 }
 0x261   :  { %1964 = vmatprep.subr.bf16.mxu0 %v2676_v58  ;;  %1996 = vmatprep.subr.bf16.mxu1 %v2694_v18 }
 0x264   :  { %1966 = vmatpush1.bf16.msra.mxu0 %v2685_v7  ;;  %1998 = vmatpush1.bf16.msra.mxu1 %v2703_v31 }
 0x265   :  { %1968 = vmatprep.subr.bf16.mxu0 %v2688_v10  ;;  %2000 = vmatprep.subr.bf16.mxu1 %v2706_v32 }
 0x268   :  { %1970 = vmatpush1.bf16.msra.mxu0 %v2697_v24  ;;  %2002 = vmatpush1.bf16.msra.mxu1 %v2713_v40 }
 0x269   :  { %1972 = vmatprep.subr.bf16.mxu0 %v2700_v27  ;;  %2004 = vmatprep.subr.bf16.mxu1 %v2716_v41 }
 0x26c   :  { %1974 = vmatpush1.bf16.msra.mxu0 %v2709_v39  ;;  %2006 = vmatpush1.bf16.msra.mxu1 %v2723_v49 }
 0x26d   :  { %2008 = vmatprep.subr.bf16.mxu0 %v2628_v4  ;;  %2040 = vmatprep.subr.bf16.mxu1 %v2641_v22 }
 0x322   :  { %v542_v53 = vpop.f32.mrb[4].mxu0  ;;  %v613_v54 = vpop.f32.mrb[4].mxu1 }
 0x323   :  { %v618_v56 = vadd.f32 %v542_v53, %v472_v38  ;;  %v544_v57 = vpop.f32.mrb[5].mxu0  ;;  %v615_v59 = vpop.f32.mrb[5].mxu1  ;;  %v620_v3 = vadd.f32 %v613_v54, %v474_v2  ;;  %v649_v2 = vld [vmem:[#allocation2 + $0x70] sm:$0xff] }
 0x324   :  { %v619_v60 = vadd.f32 %v544_v57, %v473_v51  ;;  %v621_v6 = vadd.f32 %v615_v59, %v475_v5  ;;  %v648_v51 = vld [vmem:[#allocation2 + $0x68] sm:$0xff]  ;;  %v650_v5 = vld [vmem:[#allocation2 + $0x78] sm:$0xff] }
 0x325   :  { %v1680_v61 = vmul.f32 -1.442695, %v618_v56  ;;  %v1682_v11 = vmul.f32 -1.442695, %v620_v3 }
 0x326   :  { %v1681_v63 = vmul.f32 -1.442695, %v619_v60 }
 0x327   :  { %2329 = vpow2.f32 %v1680_v61 }
 0x328   :  { %2331 = vpow2.f32 %v1681_v63 }
 0x329   :  { %2333 = vtanh.f32 %v621_v6 }
 0x32a   :  { %2335 = vpow2.f32 %v1682_v11 }
 0x331   :  { %v2330_v12 = vpop.eup %2329 }
 0x332   :  { %v631_v13 = vadd.f32 1.0, %v2330_v12  ;;  %v2332_v16 = vpop.eup %2331 }
 0x333   :  { %v632_v19 = vadd.f32 1.0, %v2332_v16  ;;  %v2334_v20 = vpop.eup %2333 }
 0x334   :  { %2337 = vrcp.f32 %v631_v13  ;;  %v2336_v21 = vpop.eup %2335 }
 0x335   :  { %2339 = vrcp.f32 %v632_v19  ;;  %v633_v34 = vadd.f32 1.0, %v2336_v21 }
 0x337   :  { %2341 = vrcp.f32 %v633_v34 }
 0x33e   :  { %v2338_v23 = vpop.eup %2337 }
 0x33f   :  { %v642_v28 = vmul.f32 %v2338_v23, %v2334_v20  ;;  %v2340_v29 = vpop.eup %2339 }
 0x340   :  { %v641_v35 = vmul.f32 %v2340_v29, %v2808_v36  ;;  %v647_v36 = vld [vmem:[#allocation2 + $0x60] sm:$0xff] }
 0x341   :  { %v2342_v44 = vpop.eup %2341 }
 0x342   :  { %v2846_v43 = vadd.f32 %v642_v28, %v641_v35 }
 0x344   :  { %2343 = vtanh.f32 %v2846_v43 }
 0x34e   :  { %v2344_v50 = vpop.eup %2343 }
 0x34f   :  { %v645_v38 = vmul.f32 %v2344_v50, %v2342_v44 }
 0x351   :  { %716 = vmatmul.mubr.f32.vlgmr.msra.gmra.mrb[6].mxu0 %v645_v38  ;;  %787 = vmatmul.mubr.f32.vlgmr.msra.gmra.mrb[6].mxu1 %v645_v38 }
 0x352   :  { %2010 = vmatpush1.bf16.msra.mxu0 %v2630_v8  ;;  %2042 = vmatpush1.bf16.msra.mxu1 %v2643_v25 }
 0x353   :  { %2012 = vmatprep.subr.bf16.mxu0 %v2632_v9  ;;  %2044 = vmatprep.subr.bf16.mxu1 %v2653_v33 }
 0x354   :  { %890 = vmatprep.mubr.f32.mxu0 %v2551_v0  ;;  %961 = vmatprep.mubr.f32.mxu1 %v2551_v0 }
 0x356   :  { %2014 = vmatpush1.bf16.msra.mxu0 %v2636_v14  ;;  %2046 = vmatpush1.bf16.msra.mxu1 %v2655_v37 }
 0x357   :  { %2016 = vmatprep.subr.bf16.mxu0 %v2639_v17  ;;  %2048 = vmatprep.subr.bf16.mxu1 %v2661_v45 }
 0x35a   :  { %2018 = vmatpush1.bf16.msra.mxu0 %v2646_v26  ;;  %2050 = vmatpush1.bf16.msra.mxu1 %v2667_v48 }
 0x35b   :  { %2020 = vmatprep.subr.bf16.mxu0 %v2650_v30  ;;  %2052 = vmatprep.subr.bf16.mxu1 %v2670_v52 }
 0x35e   :  { %2022 = vmatpush1.bf16.msra.mxu0 %v2659_v42  ;;  %2054 = vmatpush1.bf16.msra.mxu1 %v2679_v62 }
 0x35f   :  { %2024 = vmatprep.subr.bf16.mxu0 %v2664_v46  ;;  %2056 = vmatprep.subr.bf16.mxu1 %v2682_v1 }
 0x362   :  { %2026 = vmatpush1.bf16.msra.mxu0 %v2673_v55  ;;  %2058 = vmatpush1.bf16.msra.mxu1 %v2691_v15 }
 0x363   :  { %2028 = vmatprep.subr.bf16.mxu0 %v2676_v58  ;;  %2060 = vmatprep.subr.bf16.mxu1 %v2694_v18 }
 0x366   :  { %2030 = vmatpush1.bf16.msra.mxu0 %v2685_v7  ;;  %2062 = vmatpush1.bf16.msra.mxu1 %v2703_v31 }
 0x367   :  { %2032 = vmatprep.subr.bf16.mxu0 %v2688_v10  ;;  %2064 = vmatprep.subr.bf16.mxu1 %v2706_v32 }
 0x36a   :  { %2034 = vmatpush1.bf16.msra.mxu0 %v2697_v24  ;;  %2066 = vmatpush1.bf16.msra.mxu1 %v2713_v40 }
 0x36b   :  { %2036 = vmatprep.subr.bf16.mxu0 %v2700_v27  ;;  %2068 = vmatprep.subr.bf16.mxu1 %v2716_v41 }
 0x36e   :  { %2038 = vmatpush1.bf16.msra.mxu0 %v2709_v39  ;;  %2070 = vmatpush1.bf16.msra.mxu1 %v2723_v49 }
 0x36f   :  { %2072 = vmatprep.subr.bf16.mxu0 %v2628_v4  ;;  %2104 = vmatprep.subr.bf16.mxu1 %v2641_v22 }
 0x424   :  { %v717_v53 = vpop.f32.mrb[6].mxu0  ;;  %v788_v54 = vpop.f32.mrb[6].mxu1 }
 0x425   :  { %v793_v56 = vadd.f32 %v717_v53, %v647_v36  ;;  %v719_v57 = vpop.f32.mrb[7].mxu0  ;;  %v790_v59 = vpop.f32.mrb[7].mxu1  ;;  %v795_v3 = vadd.f32 %v788_v54, %v649_v2  ;;  %v824_v2 = vld [vmem:[#allocation2 + $0x90] sm:$0xff] }
 0x426   :  { %v794_v60 = vadd.f32 %v719_v57, %v648_v51  ;;  %v796_v6 = vadd.f32 %v790_v59, %v650_v5  ;;  %v823_v51 = vld [vmem:[#allocation2 + $0x88] sm:$0xff]  ;;  %v825_v5 = vld [vmem:[#allocation2 + $0x98] sm:$0xff] }
 0x427   :  { %v1683_v61 = vmul.f32 -1.442695, %v793_v56  ;;  %v1685_v11 = vmul.f32 -1.442695, %v795_v3 }
 0x428   :  { %v1684_v63 = vmul.f32 -1.442695, %v794_v60 }
 0x429   :  { %2345 = vpow2.f32 %v1683_v61 }
 0x42a   :  { %2347 = vpow2.f32 %v1684_v63 }
 0x42b   :  { %2349 = vtanh.f32 %v796_v6 }
 0x42c   :  { %2351 = vpow2.f32 %v1685_v11 }
 0x433   :  { %v2346_v12 = vpop.eup %2345 }
 0x434   :  { %v806_v13 = vadd.f32 1.0, %v2346_v12  ;;  %v2348_v16 = vpop.eup %2347 }
 0x435   :  { %v807_v19 = vadd.f32 1.0, %v2348_v16  ;;  %v2350_v20 = vpop.eup %2349 }
 0x436   :  { %2353 = vrcp.f32 %v806_v13  ;;  %v2352_v21 = vpop.eup %2351 }
 0x437   :  { %2355 = vrcp.f32 %v807_v19  ;;  %v808_v34 = vadd.f32 1.0, %v2352_v21 }
 0x439   :  { %2357 = vrcp.f32 %v808_v34 }
 0x440   :  { %v2354_v23 = vpop.eup %2353 }
 0x441   :  { %v817_v28 = vmul.f32 %v2354_v23, %v2350_v20  ;;  %v2356_v29 = vpop.eup %2355 }
 0x442   :  { %v816_v35 = vmul.f32 %v2356_v29, %v2846_v43  ;;  %v822_v43 = vld [vmem:[#allocation2 + $0x80] sm:$0xff] }
 0x443   :  { %v2358_v50 = vpop.eup %2357 }
 0x444   :  { %v2884_v44 = vadd.f32 %v817_v28, %v816_v35 }
 0x446   :  { %2359 = vtanh.f32 %v2884_v44 }
 0x450   :  { %v2360_v38 = vpop.eup %2359 }
 0x451   :  { %v820_v36 = vmul.f32 %v2360_v38, %v2358_v50 }
 0x453   :  { %891 = vmatmul.mubr.f32.vlgmr.msra.gmra.mrb[8].mxu0 %v820_v36  ;;  %962 = vmatmul.mubr.f32.vlgmr.msra.gmra.mrb[8].mxu1 %v820_v36 }
 0x454   :  { %2074 = vmatpush1.bf16.msra.mxu0 %v2630_v8  ;;  %2106 = vmatpush1.bf16.msra.mxu1 %v2643_v25 }
 0x455   :  { %2076 = vmatprep.subr.bf16.mxu0 %v2632_v9  ;;  %2108 = vmatprep.subr.bf16.mxu1 %v2653_v33 }
 0x456   :  { %1065 = vmatprep.mubr.f32.mxu0 %v2551_v0  ;;  %1136 = vmatprep.mubr.f32.mxu1 %v2551_v0 }
 0x458   :  { %2078 = vmatpush1.bf16.msra.mxu0 %v2636_v14  ;;  %2110 = vmatpush1.bf16.msra.mxu1 %v2655_v37 }
 0x459   :  { %2080 = vmatprep.subr.bf16.mxu0 %v2639_v17  ;;  %2112 = vmatprep.subr.bf16.mxu1 %v2661_v45 }
 0x45c   :  { %2082 = vmatpush1.bf16.msra.mxu0 %v2646_v26  ;;  %2114 = vmatpush1.bf16.msra.mxu1 %v2667_v48 }
 0x45d   :  { %2084 = vmatprep.subr.bf16.mxu0 %v2650_v30  ;;  %2116 = vmatprep.subr.bf16.mxu1 %v2670_v52 }
 0x460   :  { %2086 = vmatpush1.bf16.msra.mxu0 %v2659_v42  ;;  %2118 = vmatpush1.bf16.msra.mxu1 %v2679_v62 }
 0x461   :  { %2088 = vmatprep.subr.bf16.mxu0 %v2664_v46  ;;  %2120 = vmatprep.subr.bf16.mxu1 %v2682_v1 }
 0x464   :  { %2090 = vmatpush1.bf16.msra.mxu0 %v2673_v55  ;;  %2122 = vmatpush1.bf16.msra.mxu1 %v2691_v15 }
 0x465   :  { %2092 = vmatprep.subr.bf16.mxu0 %v2676_v58  ;;  %2124 = vmatprep.subr.bf16.mxu1 %v2694_v18 }
 0x468   :  { %2094 = vmatpush1.bf16.msra.mxu0 %v2685_v7  ;;  %2126 = vmatpush1.bf16.msra.mxu1 %v2703_v31 }
 0x469   :  { %2096 = vmatprep.subr.bf16.mxu0 %v2688_v10  ;;  %2128 = vmatprep.subr.bf16.mxu1 %v2706_v32 }
 0x46c   :  { %2098 = vmatpush1.bf16.msra.mxu0 %v2697_v24  ;;  %2130 = vmatpush1.bf16.msra.mxu1 %v2713_v40 }
 0x46d   :  { %2100 = vmatprep.subr.bf16.mxu0 %v2700_v27  ;;  %2132 = vmatprep.subr.bf16.mxu1 %v2716_v41 }
 0x470   :  { %2102 = vmatpush1.bf16.msra.mxu0 %v2709_v39  ;;  %2134 = vmatpush1.bf16.msra.mxu1 %v2723_v49 }
 0x471   :  { %2136 = vmatprep.subr.bf16.mxu0 %v2628_v4  ;;  %2168 = vmatprep.subr.bf16.mxu1 %v2641_v22 }
 0x526   :  { %v892_v53 = vpop.f32.mrb[8].mxu0  ;;  %v963_v54 = vpop.f32.mrb[8].mxu1 }
 0x527   :  { %v968_v56 = vadd.f32 %v892_v53, %v822_v43  ;;  %v894_v57 = vpop.f32.mrb[9].mxu0  ;;  %v965_v59 = vpop.f32.mrb[9].mxu1  ;;  %v970_v3 = vadd.f32 %v963_v54, %v824_v2  ;;  %v999_v2 = vld [vmem:[#allocation2 + $0xb0] sm:$0xff] }
 0x528   :  { %v969_v60 = vadd.f32 %v894_v57, %v823_v51  ;;  %v971_v6 = vadd.f32 %v965_v59, %v825_v5  ;;  %v998_v51 = vld [vmem:[#allocation2 + $0xa8] sm:$0xff]  ;;  %v1000_v5 = vld [vmem:[#allocation2 + $0xb8] sm:$0xff] }
 0x529   :  { %v1686_v61 = vmul.f32 -1.442695, %v968_v56  ;;  %v1688_v11 = vmul.f32 -1.442695, %v970_v3 }
 0x52a   :  { %v1687_v63 = vmul.f32 -1.442695, %v969_v60 }
 0x52b   :  { %2361 = vpow2.f32 %v1686_v61 }
 0x52c   :  { %2363 = vpow2.f32 %v1687_v63 }
 0x52d   :  { %2365 = vtanh.f32 %v971_v6 }
 0x52e   :  { %2367 = vpow2.f32 %v1688_v11 }
 0x535   :  { %v2362_v12 = vpop.eup %2361 }
 0x536   :  { %v981_v13 = vadd.f32 1.0, %v2362_v12  ;;  %v2364_v16 = vpop.eup %2363 }
 0x537   :  { %v982_v19 = vadd.f32 1.0, %v2364_v16  ;;  %v2366_v20 = vpop.eup %2365 }
 0x538   :  { %2369 = vrcp.f32 %v981_v13  ;;  %v2368_v21 = vpop.eup %2367 }
 0x539   :  { %2371 = vrcp.f32 %v982_v19  ;;  %v983_v34 = vadd.f32 1.0, %v2368_v21 }
 0x53b   :  { %2373 = vrcp.f32 %v983_v34 }
 0x542   :  { %v2370_v23 = vpop.eup %2369 }
 0x543   :  { %v992_v28 = vmul.f32 %v2370_v23, %v2366_v20  ;;  %v2372_v29 = vpop.eup %2371 }
 0x544   :  { %v991_v35 = vmul.f32 %v2372_v29, %v2884_v44  ;;  %v997_v44 = vld [vmem:[#allocation2 + $0xa0] sm:$0xff] }
 0x545   :  { %v2374_v38 = vpop.eup %2373 }
 0x546   :  { %v2922_v50 = vadd.f32 %v992_v28, %v991_v35 }
 0x548   :  { %2375 = vtanh.f32 %v2922_v50 }
 0x552   :  { %v2376_v36 = vpop.eup %2375 }
 0x553   :  { %v995_v43 = vmul.f32 %v2376_v36, %v2374_v38 }
 0x555   :  { %1066 = vmatmul.mubr.f32.vlgmr.msra.gmra.mrb[10].mxu0 %v995_v43  ;;  %1137 = vmatmul.mubr.f32.vlgmr.msra.gmra.mrb[10].mxu1 %v995_v43 }
 0x556   :  { %2138 = vmatpush1.bf16.msra.mxu0 %v2630_v8  ;;  %2170 = vmatpush1.bf16.msra.mxu1 %v2643_v25 }
 0x557   :  { %2140 = vmatprep.subr.bf16.mxu0 %v2632_v9  ;;  %2172 = vmatprep.subr.bf16.mxu1 %v2653_v33 }
 0x558   :  { %1240 = vmatprep.mubr.f32.mxu0 %v2551_v0  ;;  %1311 = vmatprep.mubr.f32.mxu1 %v2551_v0 }
 0x55a   :  { %2142 = vmatpush1.bf16.msra.mxu0 %v2636_v14  ;;  %2174 = vmatpush1.bf16.msra.mxu1 %v2655_v37 }
 0x55b   :  { %2144 = vmatprep.subr.bf16.mxu0 %v2639_v17  ;;  %2176 = vmatprep.subr.bf16.mxu1 %v2661_v45 }
 0x55e   :  { %2146 = vmatpush1.bf16.msra.mxu0 %v2646_v26  ;;  %2178 = vmatpush1.bf16.msra.mxu1 %v2667_v48 }
 0x55f   :  { %2148 = vmatprep.subr.bf16.mxu0 %v2650_v30  ;;  %2180 = vmatprep.subr.bf16.mxu1 %v2670_v52 }
 0x562   :  { %2150 = vmatpush1.bf16.msra.mxu0 %v2659_v42  ;;  %2182 = vmatpush1.bf16.msra.mxu1 %v2679_v62 }
 0x563   :  { %2152 = vmatprep.subr.bf16.mxu0 %v2664_v46  ;;  %2184 = vmatprep.subr.bf16.mxu1 %v2682_v1 }
 0x566   :  { %2154 = vmatpush1.bf16.msra.mxu0 %v2673_v55  ;;  %2186 = vmatpush1.bf16.msra.mxu1 %v2691_v15 }
 0x567   :  { %2156 = vmatprep.subr.bf16.mxu0 %v2676_v58  ;;  %2188 = vmatprep.subr.bf16.mxu1 %v2694_v18 }
 0x56a   :  { %2158 = vmatpush1.bf16.msra.mxu0 %v2685_v7  ;;  %2190 = vmatpush1.bf16.msra.mxu1 %v2703_v31 }
 0x56b   :  { %2160 = vmatprep.subr.bf16.mxu0 %v2688_v10  ;;  %2192 = vmatprep.subr.bf16.mxu1 %v2706_v32 }
 0x56e   :  { %2162 = vmatpush1.bf16.msra.mxu0 %v2697_v24  ;;  %2194 = vmatpush1.bf16.msra.mxu1 %v2713_v40 }
 0x56f   :  { %2164 = vmatprep.subr.bf16.mxu0 %v2700_v27  ;;  %2196 = vmatprep.subr.bf16.mxu1 %v2716_v41 }
 0x572   :  { %2166 = vmatpush1.bf16.msra.mxu0 %v2709_v39  ;;  %2198 = vmatpush1.bf16.msra.mxu1 %v2723_v49 }
 0x573   :  { %2200 = vmatprep.subr.bf16.mxu0 %v2628_v4  ;;  %2232 = vmatprep.subr.bf16.mxu1 %v2641_v22 }
 0x628   :  { %v1067_v53 = vpop.f32.mrb[10].mxu0  ;;  %v1138_v54 = vpop.f32.mrb[10].mxu1 }
 0x629   :  { %v1143_v56 = vadd.f32 %v1067_v53, %v997_v44  ;;  %v1069_v57 = vpop.f32.mrb[11].mxu0  ;;  %v1140_v59 = vpop.f32.mrb[11].mxu1  ;;  %v1145_v3 = vadd.f32 %v1138_v54, %v999_v2  ;;  %v1523_v53 = vld [vmem:[%s3102_s2 + $0x10] sm:$0xff]  ;;  %v1524_v54 = vld [vmem:[%s3102_s2 + $0x18] sm:$0xff]  ;;  %v1529_v2 = vld [vmem:[%s3102_s2 + $0x40] sm:$0xff] }
 0x62a   :  { %v1144_v60 = vadd.f32 %v1069_v57, %v998_v51  ;;  %v1146_v6 = vadd.f32 %v1140_v59, %v1000_v5  ;;  %v1525_v57 = vld [vmem:[%s3102_s2 + $0x20] sm:$0xff]  ;;  %v1526_v59 = vld [vmem:[%s3102_s2 + $0x28] sm:$0xff] }
 0x62b   :  { %v1689_v61 = vmul.f32 -1.442695, %v1143_v56  ;;  %v1691_v11 = vmul.f32 -1.442695, %v1145_v3  ;;  %v2267_v56 = vpack.c.bf16 %v1524_v54, %v1523_v53  ;;  %v1530_v3 = vld [vmem:[%s3102_s2 + $0x48] sm:$0xff] }
 0x62c   :  { %v1690_v63 = vmul.f32 -1.442695, %v1144_v60  ;;  %v2270_v60 = vpack.c.bf16 %v1526_v59, %v1525_v57  ;;  %v2276_v5 = vpack.c.bf16 %v1530_v3, %v1529_v2 }
 0x62d   :  { %2377 = vpow2.f32 %v1689_v61  ;;  %v1527_v61 = vld [vmem:[%s3102_s2 + $0x30] sm:$0xff] }
 0x62e   :  { %2379 = vpow2.f32 %v1690_v63 }
 0x62f   :  { %2381 = vtanh.f32 %v1146_v6  ;;  %v1531_v6 = vld [vmem:[%s3102_s2 + $0x50] sm:$0xff] }
 0x630   :  { %2383 = vpow2.f32 %v1691_v11  ;;  %v1532_v11 = vld [vmem:[%s3102_s2 + $0x58] sm:$0xff] }
 0x637   :  { %v2378_v4 = vpop.eup %2377 }
 0x638   :  { %v1156_v12 = vadd.f32 1.0, %v2378_v4  ;;  %v2380_v22 = vpop.eup %2379  ;;  %v2279_v4 = vpack.c.bf16 %v1532_v11, %v1531_v6 }
 0x639   :  { %v1157_v13 = vadd.f32 1.0, %v2380_v22  ;;  %v2382_v16 = vpop.eup %2381  ;;  %v1534_v22 = vld [vmem:[%s3102_s2 + $0x68] sm:$0xff] }
 0x63a   :  { %2385 = vrcp.f32 %v1156_v12  ;;  %v2384_v19 = vpop.eup %2383  ;;  %v1533_v12 = vld [vmem:[%s3102_s2 + $0x60] sm:$0xff] }
 0x63b   :  { %2387 = vrcp.f32 %v1157_v13  ;;  %v1158_v28 = vadd.f32 1.0, %v2384_v19  ;;  %v2282_v13 = vpack.c.bf16 %v1534_v22, %v1533_v12  ;;  %v1536_v19 = vld [vmem:[%s3102_s2 + $0x78] sm:$0xff] }
 0x63d   :  { %2389 = vrcp.f32 %v1158_v28 }
 0x644   :  { %v2386_v20 = vpop.eup %2385 }
 0x645   :  { %v1167_v21 = vmul.f32 %v2386_v20, %v2382_v16  ;;  %v2388_v23 = vpop.eup %2387  ;;  %v1535_v16 = vld [vmem:[%s3102_s2 + $0x70] sm:$0xff] }
 0x646   :  { %v1166_v29 = vmul.f32 %v2388_v23, %v2922_v50  ;;  %v2285_v20 = vpack.c.bf16 %v1536_v19, %v1535_v16  ;;  %v1348_v23 = vld [vmem:[#allocation2 + $0xe8] sm:$0xff] }
 0x647   :  { %v2390_v35 = vpop.eup %2389 }
 0x648   :  { %v2960_v34 = vadd.f32 %v1167_v21, %v1166_v29  ;;  %v1347_v21 = vld [vmem:[#allocation2 + $0xe0] sm:$0xff] }
 0x64a   :  { %2391 = vtanh.f32 %v2960_v34 }
 0x654   :  { %v2392_v38 = vpop.eup %2391 }
 0x655   :  { %v1170_v36 = vmul.f32 %v2392_v38, %v2390_v35 }
 0x657   :  { %1241 = vmatmul.mubr.f32.vlgmr.msra.gmra.mrb[12].mxu0 %v1170_v36  ;;  %1312 = vmatmul.mubr.f32.vlgmr.msra.gmra.mrb[12].mxu1 %v1170_v36 }
 0x658   :  { %2202 = vmatpush1.bf16.msra.mxu0 %v2630_v8  ;;  %2234 = vmatpush1.bf16.msra.mxu1 %v2643_v25  ;;  %v2552_v8 = vmov 0.0|0.0  }
 0x659   :  { %2204 = vmatprep.subr.bf16.mxu0 %v2632_v9  ;;  %2236 = vmatprep.subr.bf16.mxu1 %v2653_v33  ;;  %v1172_v9 = vld [vmem:[#allocation2 + $0xc0] sm:$0xff] }
 0x65a   :  { %1415 = vmatprep.mubr.f32.mxu0 %v2551_v0  ;;  %1486 = vmatprep.mubr.f32.mxu1 %v2551_v0 }
 0x65c   :  { %2206 = vmatpush1.bf16.msra.mxu0 %v2636_v14  ;;  %2238 = vmatpush1.bf16.msra.mxu1 %v2655_v37  ;;  %v1173_v14 = vld [vmem:[#allocation2 + $0xc8] sm:$0xff] }
 0x65d   :  { %2208 = vmatprep.subr.bf16.mxu0 %v2639_v17  ;;  %2240 = vmatprep.subr.bf16.mxu1 %v2661_v45 }
 0x660   :  { %2210 = vmatpush1.bf16.msra.mxu0 %v2646_v26  ;;  %2242 = vmatpush1.bf16.msra.mxu1 %v2667_v48 }
 0x661   :  { %2212 = vmatprep.subr.bf16.mxu0 %v2650_v30  ;;  %2244 = vmatprep.subr.bf16.mxu1 %v2670_v52  ;;  %v1175_v52 = vld [vmem:[#allocation2 + $0xd8] sm:$0xff] }
 0x664   :  { %2214 = vmatpush1.bf16.msra.mxu0 %v2659_v42  ;;  %2246 = vmatpush1.bf16.msra.mxu1 %v2679_v62 }
 0x665   :  { %2216 = vmatprep.subr.bf16.mxu0 %v2664_v46  ;;  %2248 = vmatprep.subr.bf16.mxu1 %v2682_v1  ;;  %v1174_v46 = vld [vmem:[#allocation2 + $0xd0] sm:$0xff] }
 0x668   :  { %2218 = vmatpush1.bf16.msra.mxu0 %v2673_v55  ;;  %2250 = vmatpush1.bf16.msra.mxu1 %v2691_v15 }
 0x669   :  { %2220 = vmatprep.subr.bf16.mxu0 %v2676_v58  ;;  %2252 = vmatprep.subr.bf16.mxu1 %v2694_v18 }
 0x66c   :  { %2222 = vmatpush1.bf16.msra.mxu0 %v2685_v7  ;;  %2254 = vmatpush1.bf16.msra.mxu1 %v2703_v31 }
 0x66d   :  { %2224 = vmatprep.subr.bf16.mxu0 %v2688_v10  ;;  %2256 = vmatprep.subr.bf16.mxu1 %v2706_v32 }
 0x670   :  { %2226 = vmatpush1.bf16.msra.mxu0 %v2697_v24  ;;  %2258 = vmatpush1.bf16.msra.mxu1 %v2713_v40 }
 0x671   :  { %2228 = vmatprep.subr.bf16.mxu0 %v2700_v27  ;;  %2260 = vmatprep.subr.bf16.mxu1 %v2716_v41  ;;  %v1521_v41 = vld [vmem:[%s3102_s2] sm:$0xff] }
 0x674   :  { %2230 = vmatpush1.bf16.msra.mxu0 %v2709_v39  ;;  %2262 = vmatpush1.bf16.msra.mxu1 %v2723_v49  ;;  %v1522_v49 = vld [vmem:[%s3102_s2 + $0x8] sm:$0xff] }
 0x675   :  { %2263 = vmatprep.subr.bf16.mxu0 %v2552_v8  ;;  %v2264_v44 = vpack.c.bf16 %v1522_v49, %v1521_v41 }
 0x72a   :  { %v1242_v17 = vpop.f32.mrb[12].mxu0  ;;  %v1313_v25 = vpop.f32.mrb[12].mxu1 }
 0x72b   :  { %v1318_v26 = vadd.f32 %v1242_v17, %v1172_v9  ;;  %v1244_v30 = vpop.f32.mrb[13].mxu0  ;;  %v1315_v33 = vpop.f32.mrb[13].mxu1  ;;  %v1320_v48 = vadd.f32 %v1313_v25, %v1174_v46  ;;  %v1349_v17 = vld [vmem:[#allocation2 + $0xf0] sm:$0xff] }
 0x72c   :  { %v1319_v37 = vadd.f32 %v1244_v30, %v1173_v14  ;;  %v1321_v55 = vadd.f32 %v1315_v33, %v1175_v52 }
 0x72d   :  { %v1692_v42 = vmul.f32 -1.442695, %v1318_v26  ;;  %v1694_v58 = vmul.f32 -1.442695, %v1320_v48  ;;  %v1350_v26 = vld [vmem:[#allocation2 + $0xf8] sm:$0xff] }
 0x72e   :  { %v1693_v45 = vmul.f32 -1.442695, %v1319_v37 }
 0x72f   :  { %2393 = vpow2.f32 %v1692_v42 }
 0x730   :  { %2395 = vpow2.f32 %v1693_v45 }
 0x731   :  { %2397 = vtanh.f32 %v1321_v55 }
 0x732   :  { %2399 = vpow2.f32 %v1694_v58 }
 0x739   :  { %v2394_v62 = vpop.eup %2393 }
 0x73a   :  { %v1331_v1 = vadd.f32 1.0, %v2394_v62  ;;  %v2396_v7 = vpop.eup %2395  ;;  %v1698_v62 = vld [vmem:[%s3103_s3] ss:$0 sm:$0xff]  ;;  %s2554_s3 = smov [#allocation8]  }
 0x73b   :  { %v1332_v10 = vadd.f32 1.0, %v2396_v7  ;;  %v2398_v15 = vpop.eup %2397  ;;  %s1647_s16 = sshll.u32 %s2554_s3, 4  ;;  %s1648_s16 = int_to_ptr.vmem [resolvable:$true] %s1647_s16 }
 0x73c   :  { %2401 = vrcp.f32 %v1331_v1  ;;  %v2400_v18 = vpop.eup %2399  ;;  %s2473_s17 = scalar_lea.vmem %s1648_s16, 128  ;;  %p2478_p3 = scmp.lt.s32.totalorder %s1648_s16, %s1648_s16 }
 0x73d   :  { %2403 = vrcp.f32 %v1332_v10  ;;  %v1333_v32 = vadd.f32 1.0, %v2400_v18  ;;  %p2474_p2 = scmp.ne.s32.totalorder %s1648_s16, %s2473_s17  ;;  %p2479_p4 = scmp.lt.s32.totalorder %s2473_s17, %s2473_s17 }
 0x73f   :  { %2405 = vrcp.f32 %v1333_v32  ;;  %p2480_p5 = por %p2479_p4, %p2478_p3 }
 0x741   :  { %p2481_p6 = pnand %p2480_p5, %p2474_p2 }
 0x746   :  { %v2402_v24 = vpop.eup %2401 }
 0x747   :  { %v1342_v27 = vmul.f32 %v2402_v24, %v2398_v15  ;;  %v2404_v31 = vpop.eup %2403 }
 0x748   :  { %v1341_v39 = vmul.f32 %v2404_v31, %v2960_v34 }
 0x749   :  { %v2406_v50 = vpop.eup %2405 }
 0x74a   :  { %v2997_v40 = vadd.f32 %v1342_v27, %v1341_v39 }
 0x74c   :  { %2407 = vtanh.f32 %v2997_v40 }
 0x756   :  { %v2408_v43 = vpop.eup %2407 }
 0x757   :  { %v1345_v51 = vmul.f32 %v2408_v43, %v2406_v50 }
 0x759   :  { %1416 = vmatmul.mubr.f32.vlgmr.msra.gmra.mrb[14].mxu0 %v1345_v51  ;;  %1487 = vmatmul.mubr.f32.vlgmr.msra.gmra.mrb[14].mxu1 %v1345_v51 }
 0x75a   :  { %2265 = vmatpush3.bf16.msra.mxu0 %v2264_v44  ;;  %1748 = vmatprep.mubr.msk.f32.mxu0 %vm2553_vm0, %v2551_v0  ;;  %v1528_v0 = vld [vmem:[%s3102_s2 + $0x38] sm:$0xff] }
 0x75b   :  { %2266 = vmatprep.subr.bf16.mxu0 %v2552_v8  ;;  %v2273_v63 = vpack.c.bf16 %v1528_v0, %v1527_v61 }
 0x75e   :  { %2268 = vmatpush3.bf16.msra.mxu0 %v2267_v56 }
 0x75f   :  { %2269 = vmatprep.subr.bf16.mxu0 %v2552_v8 }
 0x762   :  { %2271 = vmatpush3.bf16.msra.mxu0 %v2270_v60 }
 0x763   :  { %2272 = vmatprep.subr.bf16.mxu0 %v2552_v8 }
 0x766   :  { %2274 = vmatpush3.bf16.msra.mxu0 %v2273_v63 }
 0x767   :  { %2275 = vmatprep.subr.bf16.mxu0 %v2552_v8 }
 0x76a   :  { %2277 = vmatpush3.bf16.msra.mxu0 %v2276_v5 }
 0x76b   :  { %2278 = vmatprep.subr.bf16.mxu0 %v2552_v8 }
 0x76e   :  { %2280 = vmatpush3.bf16.msra.mxu0 %v2279_v4 }
 0x76f   :  { %2281 = vmatprep.subr.bf16.mxu0 %v2552_v8 }
 0x772   :  { %2283 = vmatpush3.bf16.msra.mxu0 %v2282_v13 }
 0x773   :  { %2284 = vmatprep.subr.bf16.mxu0 %v2552_v8 }
 0x776   :  { %2286 = vmatpush3.bf16.msra.mxu0 %v2285_v20 }
 0x779   :  { %1749 = vmatmul.mubr.f32.vlgmr.msra.gmra.mrb[16].mxu0 %v2769_v47 }
 0x82c   :  { %v1417_v28 = vpop.f32.mrb[14].mxu0  ;;  %v1488_v29 = vpop.f32.mrb[14].mxu1 }
 0x82d   :  { %v1493_v34 = vadd.f32 %v1417_v28, %v1347_v21  ;;  %v1419_v35 = vpop.f32.mrb[15].mxu0  ;;  %v1490_v38 = vpop.f32.mrb[15].mxu1  ;;  %v1495_v25 = vadd.f32 %v1488_v29, %v1349_v17 }
 0x82e   :  { %v1494_v36 = vadd.f32 %v1419_v35, %v1348_v23  ;;  %v1496_v30 = vadd.f32 %v1490_v38, %v1350_v26 }
 0x82f   :  { %v1695_v9 = vmul.f32 -1.442695, %v1493_v34  ;;  %v1697_v8 = vmul.f32 -1.442695, %v1495_v25 }
 0x830   :  { %v1696_v14 = vmul.f32 -1.442695, %v1494_v36 }
 0x831   :  { %2409 = vpow2.f32 %v1695_v9 }
 0x832   :  { %2411 = vpow2.f32 %v1696_v14 }
 0x833   :  { %2413 = vtanh.f32 %v1496_v30 }
 0x834   :  { %2415 = vpow2.f32 %v1697_v8 }
 0x83b   :  { %v2410_v33 = vpop.eup %2409 }
 0x83c   :  { %v1506_v37 = vadd.f32 1.0, %v2410_v33  ;;  %v2412_v47 = vpop.eup %2411 }
 0x83d   :  { %v1507_v42 = vadd.f32 1.0, %v2412_v47  ;;  %v2414_v45 = vpop.eup %2413 }
 0x83e   :  { %2417 = vrcp.f32 %v1506_v37  ;;  %v2416_v46 = vpop.eup %2415 }
 0x83f   :  { %2419 = vrcp.f32 %v1507_v42  ;;  %v1508_v58 = vadd.f32 1.0, %v2416_v46 }
 0x841   :  { %2421 = vrcp.f32 %v1508_v58 }
 0x848   :  { %v2418_v48 = vpop.eup %2417 }
 0x849   :  { %v1517_v52 = vmul.f32 %v2418_v48, %v2414_v45  ;;  %v2420_v55 = vpop.eup %2419 }
 0x84a   :  { %v1516_v1 = vmul.f32 %v2420_v55, %v2997_v40 }
 0x84b   :  { %v2422_v27 = vpop.eup %2421 }
 0x84c   :  { %v1610_v7 = vpop.f32.mrb[16].mxu0  ;;  %v1518_v10 = vadd.f32 %v1517_v52, %v1516_v1 }
 0x84d   :  { %v1611_v15 = vadd.f32 %v1698_v62, %v1610_v7  ;;  %v1750_v18 = vpop.f32.mrb[17].mxu0 }
 0x84e   :  { %1630 = vst [vmem:[#allocation10] sm:$0xff] %v1518_v10  ;;  %2423 = vtanh.f32 %v1518_v10 }
 0x84f   :  { %v1615_v24 = vsel %vm1614_vm1, %v1611_v15, -inf }
 0x850   :  { %1616 = vmax.xlane.f32.xlu0 %v1615_v24 }
 0x858   :  { %v2424_v31 = vpop.eup %2423 }
 0x859   :  { %v1520_v32 = vmul.f32 %v2424_v31, %v2422_v27 }
 0x85b   :  { %1629 = vst [vmem:[#allocation8] sm:$0xff] %v1520_v32 }
 0x8dd   :  { %v1617_v39 = vpop.xlane.xlu0 %1616 }
 0x8de   :  { %v1618_v41 = vsub.f32 %v1611_v15, %v1617_v39 }
 0x8e0   :  { %v1619_v49 = vmul.f32 1.442695, %v1618_v41 }
 0x8e2   :  { %2425 = vpow2.f32 %v1619_v49 }
 0x8ec   :  { %v2426_v40 = vpop.eup %2425 }
 0x8ed   :  { %v1621_v50 = vsel %vm1614_vm1, %v2426_v40, 0.0 }
 0x8ee   :  { %1622 = vadd.xlane.f32.xlu0 %v1621_v50 }
 0x8ef   :  { %2484 = shalt.err (!%p2481_p6)
}
 0x8f0   :  { %s2485_s20 = scalar_lea.hbm %s3107_s7, 128 }
 0x8f1   :  { %p2486_p7 = scmp.ne.s32.totalorder %s3107_s7, %s2485_s20  ;;  %p2489_p8 = scmp.lt.u32.totalorder %s2485_s20, %s3107_s7 }
 0x8f3   :  { %p2491_p9 = pnand %p2489_p8, %p2486_p7 }
 0x8f5   :  { %2494 = shalt.err (!%p2491_p9)
}
 0x8f6   :  { %1650 = dma.vmem_to_hbm [thread:$0]  %s1648_s16, 128, %s3107_s7, [#allocation9]  }
 0x8f7   :  { %s2555_s27 = smov [#allocation10]  }
 0x8f8   :  { %s1657_s29 = sshll.u32 %s2555_s27, 4  ;;  %s1658_s29 = int_to_ptr.vmem [resolvable:$true] %s1657_s29 }
 0x8f9   :  { %s2495_s0 = scalar_lea.vmem %s1658_s29, 128  ;;  %p2500_p11 = scmp.lt.s32.totalorder %s1658_s29, %s1658_s29 }
 0x8fa   :  { %p2496_p10 = scmp.ne.s32.totalorder %s1658_s29, %s2495_s0  ;;  %p2501_p12 = scmp.lt.s32.totalorder %s2495_s0, %s2495_s0 }
 0x8fc   :  { %p2502_p13 = por %p2501_p12, %p2500_p11 }
 0x8fe   :  { %p2503_p0 = pnand %p2502_p13, %p2496_p10 }
 0x900   :  { %2506 = shalt.err (!%p2503_p0)
}
 0x901   :  { %s2507_s30 = scalar_lea.hbm %s3108_s8, 128 }
 0x902   :  { %p2508_p1 = scmp.ne.s32.totalorder %s3108_s8, %s2507_s30  ;;  %p2511_p2 = scmp.lt.u32.totalorder %s2507_s30, %s3108_s8 }
 0x904   :  { %p2513_p3 = pnand %p2511_p2, %p2508_p1 }
 0x906   :  { %2516 = shalt.err (!%p2513_p3)
}
 0x907   :  { %1660 = dma.vmem_to_hbm [thread:$0]  %s1658_s29, 128, %s3108_s8, [#allocation9]  }
 0x908   :  { %s2556_s12 = smov [#allocation7]  }
 0x909   :  { %s1637_s13 = sshll.u32 %s2556_s12, 4  ;;  %s1638_s13 = int_to_ptr.vmem [resolvable:$true] %s1637_s13 }
 0x90a   :  { %s2517_s14 = scalar_lea.vmem %s1638_s13, 128  ;;  %p2522_p5 = scmp.lt.s32.totalorder %s1638_s13, %s1638_s13 }
 0x90b   :  { %p2518_p4 = scmp.ne.s32.totalorder %s1638_s13, %s2517_s14  ;;  %p2523_p6 = scmp.lt.s32.totalorder %s2517_s14, %s2517_s14 }
 0x90d   :  { %p2524_p7 = por %p2523_p6, %p2522_p5 }
 0x90f   :  { %p2525_p8 = pnand %p2524_p7, %p2518_p4 }
 0x97b   :  { %v1623_v43 = vpop.xlane.xlu0 %1622 }
 0x97c   :  { %2427 = vlog2.f32 %v1623_v43 }
 0x986   :  { %v2428_v44 = vpop.eup %2427 }
 0x987   :  { %v1625_v51 = vmul.f32 0.6931472, %v2428_v44 }
 0x989   :  { %v1626_v53 = vadd.f32 %v1625_v51, %v1617_v39 }
 0x98b   :  { %v1627_v54 = vsub.f32 %v1611_v15, %v1626_v53 }
 0x98d   :  { %1628 = vst.msk [vmem:[#allocation7] sm:$0xff] %vm1614_vm1, %v1627_v54 }
 0x98e   :  { %2528 = shalt.err (!%p2525_p8)
}
 0x98f   :  { %s2529_s15 = scalar_lea.hbm %s3106_s6, 128 }
 0x990   :  { %p2530_p9 = scmp.ne.s32.totalorder %s3106_s6, %s2529_s15  ;;  %p2533_p10 = scmp.lt.u32.totalorder %s2529_s15, %s3106_s6 }
 0x992   :  { %p2535_p11 = pnand %p2533_p10, %p2530_p9 }
 0x994   :  { %2538 = shalt.err (!%p2535_p11)
}
 0x995   :  { %1640 = dma.vmem_to_hbm [thread:$0]  %s1638_s13, 128, %s3106_s6, [#allocation4]  }
 0x996   :  { %2543 = dma.done.wait [#allocation4], 128  }
 0x997   :  { %2544 = vsyncadd [#allocation4], 4294967168 }
 0x998   :  { %2545 = dma.done.wait [#allocation9], 256  }
 0x999   :  { %2546 = vsyncadd [#allocation9], 4294967040 }
 0x99a   :  { %1670 = vsyncpa [#allocation3], 1 }
 0x99b   :  { %1671 = vsyncpa [#allocation6], 1 }
 0x99c   :  { %1672 = vsyncpa [#allocation4], 1 }
 0x99d   :  { %1673 = vsyncpa [#allocation9], 1 }

</bundles_post_ra>
